<compile_context>
chip_gen: v6e
topology: v6e:2x2x1
jax: 0.10.0
libtpu: 0.0.40
codegen_flags: <defaults>
</compile_context>

<pallas_src>
import functools
import math

import jax
import jax.numpy as jnp
from jax.experimental import pallas as pl
from jax.experimental.pallas import tpu as pltpu


# ----------------------------------------------------------------------------
# Helpers
# ----------------------------------------------------------------------------
def _layer_norm(x, gamma, beta, eps=1e-5):
    mean = jnp.mean(x, axis=-1, keepdims=True)
    var = jnp.mean((x - mean) ** 2, axis=-1, keepdims=True)
    return (x - mean) * jax.lax.rsqrt(var + eps) * gamma + beta


def _choose_batch_block(B, S, max_rows=512):
    """Largest divisor of B such that B_blk * S <= max_rows (>=1)."""
    best = 1
    for d in range(1, B + 1):
        if B % d == 0 and d * S <= max_rows:
            best = d
    return best


# ----------------------------------------------------------------------------
# Kernel: one encoder layer for one batch block; layers carried in VMEM scratch.
# ----------------------------------------------------------------------------
def encoder_stack_kernel(
    x_ref,          # (B_blk, S, E)   input activations (f32)
    wqkv_ref,       # (E, 3E)         in_proj_weight.T (bf16, q-scale folded)
    bqkv_ref,       # (1, 3E)         f32 (q-scale folded)
    wo_ref,         # (E, E)          out_proj.weight.T (bf16)
    bo_ref,         # (1, E)          f32
    w1_ref,         # (E, F)          linear1.weight.T (bf16)
    b1_ref,         # (1, F)          f32
    w2_ref,         # (F, E)          linear2.weight.T (bf16)
    b2_ref,         # (1, E)          f32
    g1_ref,         # (1, E)          norm1 gamma
    bt1_ref,        # (1, E)          norm1 beta
    g2_ref,         # (1, E)          norm2 gamma
    bt2_ref,        # (1, E)          norm2 beta
    o_ref,          # (B_blk, S, E)   output
    carry_ref,      # (B_blk, S, E)   f32 VMEM scratch: activations across layers
    *,
    nhead: int,
):
    layer = pl.program_id(1)

    @pl.when(layer == 0)
    def _():
        carry_ref[...] = x_ref[...].astype(jnp.float32)

    Bb, S, E = carry_ref.shape
    dh = E // nhead
    rows = Bb * S
    BH = Bb * nhead
    cdt = wqkv_ref.dtype                       # matmul compute dtype (bf16)

    x = carry_ref[...]                         # (Bb, S, E) f32
    xf = x.reshape(rows, E)
    xc = xf.astype(cdt)

    # ---- self attention (PyTorch MultiheadAttention, no mask) ----
    # QKV projection; the 1/sqrt(dh) q-scale is folded into wqkv/bqkv at init.
    qkv = jnp.dot(xc, wqkv_ref[...], preferred_element_type=jnp.float32)
    qkv = qkv + bqkv_ref[...]                  # (rows, 3E) f32

    def split_heads(t):                        # (rows, E) -> (Bb*nhead, S, dh)
        t = t.reshape(Bb, S, nhead, dh)
        t = jnp.transpose(t, (0, 2, 1, 3))     # (Bb, nhead, S, dh)
        return t.reshape(BH, S, dh)

    q = split_heads(qkv[:, :E]).astype(cdt)
    k = split_heads(qkv[:, E:2 * E]).astype(cdt)
    v = split_heads(qkv[:, 2 * E:]).astype(cdt)

    # Head-batched score / softmax / PV contractions.
    s = jnp.einsum("bqd,bkd->bqk", q, k,
                   preferred_element_type=jnp.float32)          # (BH, S, S)
    s = s - jnp.max(s, axis=-1, keepdims=True)
    p = jnp.exp(s)
    p = p * pl.reciprocal(jnp.sum(p, axis=-1, keepdims=True), approx=True)
    ctx = jnp.einsum("bqk,bkd->bqd", p.astype(cdt), v,
                     preferred_element_type=jnp.float32)        # (BH, S, dh)

    ctx = ctx.reshape(Bb, nhead, S, dh)
    ctx = jnp.transpose(ctx, (0, 2, 1, 3)).reshape(rows, E)     # merge heads
    attn = jnp.dot(ctx.astype(cdt), wo_ref[...],
                   preferred_element_type=jnp.float32) + bo_ref[...]

    # dropout1 == identity (eval);  residual + post-norm1
    y = _layer_norm(xf + attn, g1_ref[...], bt1_ref[...])

    # ---- feed forward (relu), dropout == identity ----
    h1 = jnp.dot(y.astype(cdt), w1_ref[...],
                 preferred_element_type=jnp.float32) + b1_ref[...]
    h1 = jnp.maximum(h1, 0.0)
    z = jnp.dot(h1.astype(cdt), w2_ref[...],
                preferred_element_type=jnp.float32) + b2_ref[...]

    # residual + post-norm2
    out = _layer_norm(y + z, g2_ref[...], bt2_ref[...]).reshape(Bb, S, E)

    carry_ref[...] = out                       # feed next layer
    o_ref[...] = out.astype(o_ref.dtype)       # final layer's content is kept


# ----------------------------------------------------------------------------
# Wrapper: single pallas_call over (batch_blocks, layers).
# ----------------------------------------------------------------------------
def _run_encoder(x_bse, p, nhead, *, b_blk=None):
    B, S, E = x_bse.shape
    L = p["wqkv"].shape[0]
    F_ = p["w1"].shape[-1]
    if b_blk is None:
        b_blk = _choose_batch_block(B, S)
    assert B % b_blk == 0 and E % nhead == 0
    nb = B // b_blk

    act_spec = pl.BlockSpec((b_blk, S, E), lambda b, l: (b, 0, 0))

    def wspec(*shape):                          # layer-sliced parameter block
        n = len(shape)
        return pl.BlockSpec((None,) + tuple(shape),
                            lambda b, l, _n=n: (l,) + (0,) * _n)

    in_specs = [
        act_spec,
        wspec(E, 3 * E), wspec(1, 3 * E),       # wqkv, bqkv
        wspec(E, E),     wspec(1, E),           # wo, bo
        wspec(E, F_),    wspec(1, F_),          # w1, b1
        wspec(F_, E),    wspec(1, E),           # w2, b2
        wspec(1, E), wspec(1, E),               # g1, bt1
        wspec(1, E), wspec(1, E),               # g2, bt2
    ]

    # Cost estimate (advisory).
    gemm_flops = 2 * L * B * S * (E * 3 * E + E * E + 2 * E * F_)
    attn_flops = 4 * L * B * S * S * E
    wbytes = 2 * L * (3 * E * E + E * E + 2 * E * F_)           # bf16 weights
    cost = pl.CostEstimate(
        flops=int(gemm_flops + attn_flops),
        transcendentals=int(L * B * nhead * S * S + 2 * L * B * S),
        bytes_accessed=int(8 * B * S * E + wbytes),
    )

    # VMEM budget: double-buffered bf16 weights + activations + intermediates.
    rows = b_blk * S
    est = (2 * 2 * (3 * E * E + E * E + 2 * E * F_)             # weight blocks
           + 4 * rows * E * 5                                   # x/out bufs + carry
           + 4 * rows * (3 * E + F_ + 6 * E)                    # qkv / ffn / misc
           + 4 * b_blk * nhead * S * S * 2)                     # scores + probs
    vmem_limit = int(min(112 * 2 ** 20, max(2 * est, 16 * 2 ** 20)))

    kernel = functools.partial(encoder_stack_kernel, nhead=nhead)
    return pl.pallas_call(
        kernel,
        out_shape=jax.ShapeDtypeStruct((B, S, E), x_bse.dtype),
        grid_spec=pltpu.PrefetchScalarGridSpec(
            num_scalar_prefetch=0,
            grid=(nb, L),
            in_specs=in_specs,
            out_specs=act_spec,
            scratch_shapes=[pltpu.VMEM((b_blk, S, E), jnp.float32)],
        ),
        compiler_params=pltpu.CompilerParams(
            dimension_semantics=("parallel", "arbitrary"),
            vmem_limit_bytes=vmem_limit,
        ),
        cost_estimate=cost,
    )(
        x_bse,
        p["wqkv"], p["bqkv"], p["wo"], p["bo"],
        p["w1"], p["b1"], p["w2"], p["b2"],
        p["g1"], p["bt1"], p["g2"], p["bt2"],
    )


def encoder_forward(src_sbe, params, nhead, *, b_blk=None):
    # src_sbe: (S, B, E), PyTorch nn.MultiheadAttention default layout.
    x = jnp.transpose(src_sbe, (1, 0, 2))      # (B, S, E)
    x = _run_encoder(x, params, nhead, b_blk=b_blk)
    return jnp.transpose(x, (1, 0, 2))         # back to (S, B, E)


# ----------------------------------------------------------------------------
# Deterministic parameter init (shapes match the PyTorch module), stacked over
# layers so the layer grid axis can slice them.  Weights stored in bf16.
# ----------------------------------------------------------------------------
def init_encoder_params(key, num_layers, d_model, dim_feedforward, nhead,
                        param_dtype=jnp.bfloat16):
    E, F_, L = d_model, dim_feedforward, num_layers
    dh = E // nhead
    scale = 1.0 / math.sqrt(dh)

    def xavier(k, shape):
        fan_out, fan_in = shape
        lim = math.sqrt(6.0 / (fan_in + fan_out))
        return jax.random.uniform(k, shape, jnp.float32, -lim, lim)

    wqkv, bqkv, wo, bo, w1, b1, w2, b2 = ([] for _ in range(8))
    for _ in range(L):
        key, *ks = jax.random.split(key, 6)
        in_proj_w = xavier(ks[0], (3 * E, E))          # (3E, E)
        out_proj_w = xavier(ks[1], (E, E))             # (E, E)
        lin1_w = xavier(ks[2], (F_, E))                # (F, E)
        lin2_w = xavier(ks[3], (E, F_))                # (E, F)
        in_proj_b = 0.01 * jax.random.normal(ks[4], (3 * E,), jnp.float32)

        # Fold the 1/sqrt(dh) attention scale into the Q projection (w and b).
        qmask = jnp.concatenate([jnp.full((E,), scale, jnp.float32),
                                 jnp.ones((2 * E,), jnp.float32)])
        wqkv.append(in_proj_w.T * qmask[None, :])      # (E, 3E)
        bqkv.append((in_proj_b * qmask)[None, :])      # (1, 3E)
        wo.append(out_proj_w.T)                        # (E, E)
        bo.append(jnp.zeros((1, E), jnp.float32))
        w1.append(lin1_w.T)                            # (E, F)
        b1.append(jnp.zeros((1, F_), jnp.float32))
        w2.append(lin2_w.T)                            # (F, E)
        b2.append(jnp.zeros((1, E), jnp.float32))

    stack = lambda xs, dt: jnp.stack(xs).astype(dt)
    return dict(
        wqkv=stack(wqkv, param_dtype),                 # (L, E, 3E)
        bqkv=stack(bqkv, jnp.float32),                 # (L, 1, 3E)
        wo=stack(wo, param_dtype),                     # (L, E, E)
        bo=stack(bo, jnp.float32),
        w1=stack(w1, param_dtype),                     # (L, E, F)
        b1=stack(b1, jnp.float32),
        w2=stack(w2, param_dtype),                     # (L, F, E)
        b2=stack(b2, jnp.float32),
        g1=jnp.ones((L, 1, E), jnp.float32),
        bt1=jnp.zeros((L, 1, E), jnp.float32),
        g2=jnp.ones((L, 1, E), jnp.float32),
        bt2=jnp.zeros((L, 1, E), jnp.float32),
    )


if __name__ == "__main__":
    # Small, module-consistent sizes.
    d_model = 32
    nhead = 4
    dim_feedforward = 64
    num_layers = 2
    seq_len = 8
    batch = 2

    key = jax.random.PRNGKey(0)
    k_x, k_p = jax.random.split(key)
    # PyTorch MultiheadAttention default layout: (seq, batch, d_model)
    src = jax.random.normal(k_x, (seq_len, batch, d_model), jnp.float32)
    params = init_encoder_params(k_p, num_layers, d_model, dim_feedforward,
                                 nhead)

    fwd = jax.jit(functools.partial(encoder_forward, nhead=nhead))
    out = fwd(src, params)
    out = jax.block_until_ready(out)
    assert out.shape == (seq_len, batch, d_model)
    assert jnp.all(jnp.isfinite(out))
    print("KERNEL_OK")
</pallas_src>

<mosaic_0001>
module attributes {stable_mosaic.version = 11 : i64} {
  func.func @encoder_stack_kernel(%arg0: i32, %arg1: i32, %arg2: memref<2x8x32xf32, #tpu.memory_space<vmem>>, %arg3: memref<1x32x96xbf16, #tpu.memory_space<vmem>>, %arg4: memref<1x1x96xf32, #tpu.memory_space<vmem>>, %arg5: memref<1x32x32xbf16, #tpu.memory_space<vmem>>, %arg6: memref<1x1x32xf32, #tpu.memory_space<vmem>>, %arg7: memref<1x32x64xbf16, #tpu.memory_space<vmem>>, %arg8: memref<1x1x64xf32, #tpu.memory_space<vmem>>, %arg9: memref<1x64x32xbf16, #tpu.memory_space<vmem>>, %arg10: memref<1x1x32xf32, #tpu.memory_space<vmem>>, %arg11: memref<1x1x32xf32, #tpu.memory_space<vmem>>, %arg12: memref<1x1x32xf32, #tpu.memory_space<vmem>>, %arg13: memref<1x1x32xf32, #tpu.memory_space<vmem>>, %arg14: memref<1x1x32xf32, #tpu.memory_space<vmem>>, %arg15: memref<2x8x32xf32, #tpu.memory_space<vmem>>, %arg16: memref<2x8x32xf32, #tpu.memory_space<vmem>>) attributes {dimension_semantics = [#tpu.dimension_semantics<parallel>, #tpu.dimension_semantics<arbitrary>], iteration_bounds = array<i64: 1, 2>, scalar_prefetch = 0 : i64, scratch_operands = 1 : i64, tpu.core_type = #tpu.core_type<tc>, window_params = [{transform_indices = @transform_0, window_bounds = array<i64: 2, 8, 32>}, {transform_indices = @transform_1, window_bounds = array<i64: 1, 32, 96>}, {transform_indices = @transform_2, window_bounds = array<i64: 1, 1, 96>}, {transform_indices = @transform_3, window_bounds = array<i64: 1, 32, 32>}, {transform_indices = @transform_4, window_bounds = array<i64: 1, 1, 32>}, {transform_indices = @transform_5, window_bounds = array<i64: 1, 32, 64>}, {transform_indices = @transform_6, window_bounds = array<i64: 1, 1, 64>}, {transform_indices = @transform_7, window_bounds = array<i64: 1, 64, 32>}, {transform_indices = @transform_8, window_bounds = array<i64: 1, 1, 32>}, {transform_indices = @transform_9, window_bounds = array<i64: 1, 1, 32>}, {transform_indices = @transform_10, window_bounds = array<i64: 1, 1, 32>}, {transform_indices = @transform_11, window_bounds = array<i64: 1, 1, 32>}, {transform_indices = @transform_12, window_bounds = array<i64: 1, 1, 32>}, {transform_indices = @transform_13, window_bounds = array<i64: 2, 8, 32>}]} {
    %c0_i32 = arith.constant 0 : i32
    %0 = arith.cmpi eq, %arg1, %c0_i32 : i32
    %1 = arith.extui %0 : i1 to i32
    %c0_i32_0 = arith.constant 0 : i32
    %2 = arith.cmpi ne, %1, %c0_i32_0 : i32
    scf.if %2 {
      %c0_63 = arith.constant 0 : index
      %c0_64 = arith.constant 0 : index
      %c0_65 = arith.constant 0 : index
      %127 = vector.load %arg2[%c0_63, %c0_64, %c0_65] : memref<2x8x32xf32, #tpu.memory_space<vmem>>, vector<2x8x32xf32>
      %c0_66 = arith.constant 0 : index
      %c0_67 = arith.constant 0 : index
      %c0_68 = arith.constant 0 : index
      %128 = vector.load %arg16[%c0_66, %c0_67, %c0_68] : memref<2x8x32xf32, #tpu.memory_space<vmem>>, vector<2x8x32xf32>
      tpu.vector_store %arg16[%c0_66, %c0_67, %c0_68], %127 {strides = array<i32>} : memref<2x8x32xf32, #tpu.memory_space<vmem>>, vector<2x8x32xf32>,
    } else {
    }
    %c0 = arith.constant 0 : index
    %c0_1 = arith.constant 0 : index
    %c0_2 = arith.constant 0 : index
    %3 = vector.load %arg16[%c0, %c0_1, %c0_2] : memref<2x8x32xf32, #tpu.memory_space<vmem>>, vector<2x8x32xf32>
    %4 = vector.shape_cast %3 : vector<2x8x32xf32> to vector<16x32xf32>
    %5 = arith.truncf %4 : vector<16x32xf32> to vector<16x32xbf16>
    %c0_3 = arith.constant 0 : index
    %c0_4 = arith.constant 0 : index
    %c0_5 = arith.constant 0 : index
    %6 = vector.load %arg3[%c0_3, %c0_4, %c0_5] : memref<1x32x96xbf16, #tpu.memory_space<vmem>>, vector<1x32x96xbf16>
    %7 = vector.shape_cast %6 : vector<1x32x96xbf16> to vector<32x96xbf16>
    %cst = arith.constant dense<0.000000e+00> : vector<16x96xf32>
    %8 = tpu.matmul %5, %7, %cst {dimension_numbers = #tpu.dot_dimension_numbers<[1], [0], [0], [1], [0, 0, 1, 1], [], []>} : vector<16x32xbf16>, vector<32x96xbf16>, vector<16x96xf32> -> vector<16x96xf32>
    %c0_6 = arith.constant 0 : index
    %c0_7 = arith.constant 0 : index
    %c0_8 = arith.constant 0 : index
    %9 = vector.load %arg4[%c0_6, %c0_7, %c0_8] : memref<1x1x96xf32, #tpu.memory_space<vmem>>, vector<1x1x96xf32>
    %10 = vector.shape_cast %9 : vector<1x1x96xf32> to vector<1x96xf32>
    %11 = vector.broadcast %10 : vector<1x96xf32> to vector<16x96xf32>
    %12 = arith.addf %8, %11 : vector<16x96xf32>
    %13 = vector.extract_strided_slice %12 {offsets = [0, 0], sizes = [16, 32], strides = [1, 1]} : vector<16x96xf32> to vector<16x32xf32>
    %14 = vector.shape_cast %13 : vector<16x32xf32> to vector<2x8x4x8xf32>
    %15 = tpu.transpose %14, [0, 2, 1, 3] : vector<2x8x4x8xf32> -> vector<2x4x8x8xf32>
    %16 = vector.shape_cast %15 : vector<2x4x8x8xf32> to vector<8x8x8xf32>
    %17 = arith.truncf %16 : vector<8x8x8xf32> to vector<8x8x8xbf16>
    %18 = vector.extract_strided_slice %12 {offsets = [0, 32], sizes = [16, 32], strides = [1, 1]} : vector<16x96xf32> to vector<16x32xf32>
    %19 = vector.shape_cast %18 : vector<16x32xf32> to vector<2x8x4x8xf32>
    %20 = tpu.transpose %19, [0, 2, 1, 3] : vector<2x8x4x8xf32> -> vector<2x4x8x8xf32>
    %21 = vector.shape_cast %20 : vector<2x4x8x8xf32> to vector<8x8x8xf32>
    %22 = arith.truncf %21 : vector<8x8x8xf32> to vector<8x8x8xbf16>
    %23 = vector.extract_strided_slice %12 {offsets = [0, 64], sizes = [16, 32], strides = [1, 1]} : vector<16x96xf32> to vector<16x32xf32>
    %24 = vector.shape_cast %23 : vector<16x32xf32> to vector<2x8x4x8xf32>
    %25 = tpu.transpose %24, [0, 2, 1, 3] : vector<2x8x4x8xf32> -> vector<2x4x8x8xf32>
    %26 = vector.shape_cast %25 : vector<2x4x8x8xf32> to vector<8x8x8xf32>
    %27 = arith.truncf %26 : vector<8x8x8xf32> to vector<8x8x8xbf16>
    "tpu.trace_start"() <{level = 10 : i32, message = "bqd,bkd->bqk"}> : () -> ()
    %cst_9 = arith.constant dense<0.000000e+00> : vector<8x8x8xf32>
    %28 = tpu.matmul %17, %22, %cst_9 {dimension_numbers = #tpu.dot_dimension_numbers<[2], [2], [1], [1], [0, 0, 0, 1, 1, 1], [0], [0]>} : vector<8x8x8xbf16>, vector<8x8x8xbf16>, vector<8x8x8xf32> -> vector<8x8x8xf32>
    "tpu.trace_stop"() : () -> ()
    %cst_10 = arith.constant dense<0xFF800000> : vector<8x8xf32>
    %29 = vector.multi_reduction <maximumf>, %28, %cst_10 [2] : vector<8x8x8xf32> to vector<8x8xf32>
    %30 = vector.shape_cast %29 : vector<8x8xf32> to vector<8x8x1xf32>
    %31 = vector.broadcast %30 : vector<8x8x1xf32> to vector<8x8x8xf32>
    %32 = arith.subf %28, %31 : vector<8x8x8xf32>
    %33 = math.exp %32 : vector<8x8x8xf32>
    %cst_11 = arith.constant dense<0.000000e+00> : vector<8x8xf32>
    %34 = vector.multi_reduction <add>, %33, %cst_11 [2] : vector<8x8x8xf32> to vector<8x8xf32>
    %35 = vector.shape_cast %34 : vector<8x8xf32> to vector<8x8x1xf32>
    %36 = tpu.reciprocal %35 {approx = true} : vector<8x8x1xf32> -> vector<8x8x1xf32>
    %37 = vector.broadcast %36 : vector<8x8x1xf32> to vector<8x8x8xf32>
    %38 = arith.mulf %33, %37 : vector<8x8x8xf32>
    %39 = arith.truncf %38 : vector<8x8x8xf32> to vector<8x8x8xbf16>
    "tpu.trace_start"() <{level = 10 : i32, message = "bqk,bkd->bqd"}> : () -> ()
    %cst_12 = arith.constant dense<0.000000e+00> : vector<8x8x8xf32>
    %40 = tpu.matmul %39, %27, %cst_12 {dimension_numbers = #tpu.dot_dimension_numbers<[2], [1], [1], [2], [0, 0, 0, 1, 1, 2], [0], [0]>} : vector<8x8x8xbf16>, vector<8x8x8xbf16>, vector<8x8x8xf32> -> vector<8x8x8xf32>
    "tpu.trace_stop"() : () -> ()
    %41 = vector.shape_cast %40 : vector<8x8x8xf32> to vector<2x4x8x8xf32>
    %42 = tpu.transpose %41, [0, 2, 1, 3] : vector<2x4x8x8xf32> -> vector<2x8x4x8xf32>
    %43 = vector.shape_cast %42 : vector<2x8x4x8xf32> to vector<16x32xf32>
    %44 = arith.truncf %43 : vector<16x32xf32> to vector<16x32xbf16>
    %c0_13 = arith.constant 0 : index
    %c0_14 = arith.constant 0 : index
    %c0_15 = arith.constant 0 : index
    %45 = vector.load %arg5[%c0_13, %c0_14, %c0_15] : memref<1x32x32xbf16, #tpu.memory_space<vmem>>, vector<1x32x32xbf16>
    %46 = vector.shape_cast %45 : vector<1x32x32xbf16> to vector<32x32xbf16>
    %cst_16 = arith.constant dense<0.000000e+00> : vector<16x32xf32>
    %47 = tpu.matmul %44, %46, %cst_16 {dimension_numbers = #tpu.dot_dimension_numbers<[1], [0], [0], [1], [0, 0, 1, 1], [], []>} : vector<16x32xbf16>, vector<32x32xbf16>, vector<16x32xf32> -> vector<16x32xf32>
    %c0_17 = arith.constant 0 : index
    %c0_18 = arith.constant 0 : index
    %c0_19 = arith.constant 0 : index
    %48 = vector.load %arg6[%c0_17, %c0_18, %c0_19] : memref<1x1x32xf32, #tpu.memory_space<vmem>>, vector<1x1x32xf32>
    %49 = vector.shape_cast %48 : vector<1x1x32xf32> to vector<1x32xf32>
    %50 = vector.broadcast %49 : vector<1x32xf32> to vector<16x32xf32>
    %51 = arith.addf %47, %50 : vector<16x32xf32>
    %52 = arith.addf %4, %51 : vector<16x32xf32>
    %c0_20 = arith.constant 0 : index
    %c0_21 = arith.constant 0 : index
    %c0_22 = arith.constant 0 : index
    %53 = vector.load %arg11[%c0_20, %c0_21, %c0_22] : memref<1x1x32xf32, #tpu.memory_space<vmem>>, vector<1x1x32xf32>
    %54 = vector.shape_cast %53 : vector<1x1x32xf32> to vector<1x32xf32>
    %c0_23 = arith.constant 0 : index
    %c0_24 = arith.constant 0 : index
    %c0_25 = arith.constant 0 : index
    %55 = vector.load %arg12[%c0_23, %c0_24, %c0_25] : memref<1x1x32xf32, #tpu.memory_space<vmem>>, vector<1x1x32xf32>
    %56 = vector.shape_cast %55 : vector<1x1x32xf32> to vector<1x32xf32>
    %cst_26 = arith.constant dense<0.000000e+00> : vector<16xf32>
    %57 = vector.multi_reduction <add>, %52, %cst_26 [1] : vector<16x32xf32> to vector<16xf32>
    %58 = vector.shape_cast %57 : vector<16xf32> to vector<16x1xf32>
    %cst_27 = arith.constant 3.200000e+01 : f32
    %59 = vector.broadcast %cst_27 : f32 to vector<16x1xf32>
    %60 = arith.divf %58, %59 : vector<16x1xf32>
    %61 = vector.broadcast %60 : vector<16x1xf32> to vector<16x32xf32>
    %62 = arith.subf %52, %61 : vector<16x32xf32>
    %63 = arith.mulf %62, %62 : vector<16x32xf32>
    %cst_28 = arith.constant dense<0.000000e+00> : vector<16xf32>
    %64 = vector.multi_reduction <add>, %63, %cst_28 [1] : vector<16x32xf32> to vector<16xf32>
    %65 = vector.shape_cast %64 : vector<16xf32> to vector<16x1xf32>
    %cst_29 = arith.constant 3.200000e+01 : f32
    %66 = vector.broadcast %cst_29 : f32 to vector<16x1xf32>
    %67 = arith.divf %65, %66 : vector<16x1xf32>
    %68 = vector.broadcast %60 : vector<16x1xf32> to vector<16x32xf32>
    %69 = arith.subf %52, %68 : vector<16x32xf32>
    %cst_30 = arith.constant 9.99999974E-6 : f32
    %70 = vector.broadcast %cst_30 : f32 to vector<16x1xf32>
    %71 = arith.addf %67, %70 : vector<16x1xf32>
    %72 = math.rsqrt %71 : vector<16x1xf32>
    %73 = vector.broadcast %72 : vector<16x1xf32> to vector<16x32xf32>
    %74 = arith.mulf %69, %73 : vector<16x32xf32>
    %75 = vector.broadcast %54 : vector<1x32xf32> to vector<16x32xf32>
    %76 = arith.mulf %74, %75 : vector<16x32xf32>
    %77 = vector.broadcast %56 : vector<1x32xf32> to vector<16x32xf32>
    %78 = arith.addf %76, %77 : vector<16x32xf32>
    %79 = arith.truncf %78 : vector<16x32xf32> to vector<16x32xbf16>
    %c0_31 = arith.constant 0 : index
    %c0_32 = arith.constant 0 : index
    %c0_33 = arith.constant 0 : index
    %80 = vector.load %arg7[%c0_31, %c0_32, %c0_33] : memref<1x32x64xbf16, #tpu.memory_space<vmem>>, vector<1x32x64xbf16>
    %81 = vector.shape_cast %80 : vector<1x32x64xbf16> to vector<32x64xbf16>
    %cst_34 = arith.constant dense<0.000000e+00> : vector<16x64xf32>
    %82 = tpu.matmul %79, %81, %cst_34 {dimension_numbers = #tpu.dot_dimension_numbers<[1], [0], [0], [1], [0, 0, 1, 1], [], []>} : vector<16x32xbf16>, vector<32x64xbf16>, vector<16x64xf32> -> vector<16x64xf32>
    %c0_35 = arith.constant 0 : index
    %c0_36 = arith.constant 0 : index
    %c0_37 = arith.constant 0 : index
    %83 = vector.load %arg8[%c0_35, %c0_36, %c0_37] : memref<1x1x64xf32, #tpu.memory_space<vmem>>, vector<1x1x64xf32>
    %84 = vector.shape_cast %83 : vector<1x1x64xf32> to vector<1x64xf32>
    %85 = vector.broadcast %84 : vector<1x64xf32> to vector<16x64xf32>
    %86 = arith.addf %82, %85 : vector<16x64xf32>
    %cst_38 = arith.constant 0.000000e+00 : f32
    %87 = vector.broadcast %cst_38 : f32 to vector<16x64xf32>
    %88 = arith.maximumf %86, %87 : vector<16x64xf32>
    %89 = arith.truncf %88 : vector<16x64xf32> to vector<16x64xbf16>
    %c0_39 = arith.constant 0 : index
    %c0_40 = arith.constant 0 : index
    %c0_41 = arith.constant 0 : index
    %90 = vector.load %arg9[%c0_39, %c0_40, %c0_41] : memref<1x64x32xbf16, #tpu.memory_space<vmem>>, vector<1x64x32xbf16>
    %91 = vector.shape_cast %90 : vector<1x64x32xbf16> to vector<64x32xbf16>
    %cst_42 = arith.constant dense<0.000000e+00> : vector<16x32xf32>
    %92 = tpu.matmul %89, %91, %cst_42 {dimension_numbers = #tpu.dot_dimension_numbers<[1], [0], [0], [1], [0, 0, 1, 1], [], []>} : vector<16x64xbf16>, vector<64x32xbf16>, vector<16x32xf32> -> vector<16x32xf32>
    %c0_43 = arith.constant 0 : index
    %c0_44 = arith.constant 0 : index
    %c0_45 = arith.constant 0 : index
    %93 = vector.load %arg10[%c0_43, %c0_44, %c0_45] : memref<1x1x32xf32, #tpu.memory_space<vmem>>, vector<1x1x32xf32>
    %94 = vector.shape_cast %93 : vector<1x1x32xf32> to vector<1x32xf32>
    %95 = vector.broadcast %94 : vector<1x32xf32> to vector<16x32xf32>
    %96 = arith.addf %92, %95 : vector<16x32xf32>
    %97 = arith.addf %78, %96 : vector<16x32xf32>
    %c0_46 = arith.constant 0 : index
    %c0_47 = arith.constant 0 : index
    %c0_48 = arith.constant 0 : index
    %98 = vector.load %arg13[%c0_46, %c0_47, %c0_48] : memref<1x1x32xf32, #tpu.memory_space<vmem>>, vector<1x1x32xf32>
    %99 = vector.shape_cast %98 : vector<1x1x32xf32> to vector<1x32xf32>
    %c0_49 = arith.constant 0 : index
    %c0_50 = arith.constant 0 : index
    %c0_51 = arith.constant 0 : index
    %100 = vector.load %arg14[%c0_49, %c0_50, %c0_51] : memref<1x1x32xf32, #tpu.memory_space<vmem>>, vector<1x1x32xf32>
    %101 = vector.shape_cast %100 : vector<1x1x32xf32> to vector<1x32xf32>
    %cst_52 = arith.constant dense<0.000000e+00> : vector<16xf32>
    %102 = vector.multi_reduction <add>, %97, %cst_52 [1] : vector<16x32xf32> to vector<16xf32>
    %103 = vector.shape_cast %102 : vector<16xf32> to vector<16x1xf32>
    %cst_53 = arith.constant 3.200000e+01 : f32
    %104 = vector.broadcast %cst_53 : f32 to vector<16x1xf32>
    %105 = arith.divf %103, %104 : vector<16x1xf32>
    %106 = vector.broadcast %105 : vector<16x1xf32> to vector<16x32xf32>
    %107 = arith.subf %97, %106 : vector<16x32xf32>
    %108 = arith.mulf %107, %107 : vector<16x32xf32>
    %cst_54 = arith.constant dense<0.000000e+00> : vector<16xf32>
    %109 = vector.multi_reduction <add>, %108, %cst_54 [1] : vector<16x32xf32> to vector<16xf32>
    %110 = vector.shape_cast %109 : vector<16xf32> to vector<16x1xf32>
    %cst_55 = arith.constant 3.200000e+01 : f32
    %111 = vector.broadcast %cst_55 : f32 to vector<16x1xf32>
    %112 = arith.divf %110, %111 : vector<16x1xf32>
    %113 = vector.broadcast %105 : vector<16x1xf32> to vector<16x32xf32>
    %114 = arith.subf %97, %113 : vector<16x32xf32>
    %cst_56 = arith.constant 9.99999974E-6 : f32
    %115 = vector.broadcast %cst_56 : f32 to vector<16x1xf32>
    %116 = arith.addf %112, %115 : vector<16x1xf32>
    %117 = math.rsqrt %116 : vector<16x1xf32>
    %118 = vector.broadcast %117 : vector<16x1xf32> to vector<16x32xf32>
    %119 = arith.mulf %114, %118 : vector<16x32xf32>
    %120 = vector.broadcast %99 : vector<1x32xf32> to vector<16x32xf32>
    %121 = arith.mulf %119, %120 : vector<16x32xf32>
    %122 = vector.broadcast %101 : vector<1x32xf32> to vector<16x32xf32>
    %123 = arith.addf %121, %122 : vector<16x32xf32>
    %124 = vector.shape_cast %123 : vector<16x32xf32> to vector<2x8x32xf32>
    %c0_57 = arith.constant 0 : index
    %c0_58 = arith.constant 0 : index
    %c0_59 = arith.constant 0 : index
    %125 = vector.load %arg16[%c0_57, %c0_58, %c0_59] : memref<2x8x32xf32, #tpu.memory_space<vmem>>, vector<2x8x32xf32>
    tpu.vector_store %arg16[%c0_57, %c0_58, %c0_59], %124 {strides = array<i32>} : memref<2x8x32xf32, #tpu.memory_space<vmem>>, vector<2x8x32xf32>,
    %c0_60 = arith.constant 0 : index
    %c0_61 = arith.constant 0 : index
    %c0_62 = arith.constant 0 : index
    %126 = vector.load %arg15[%c0_60, %c0_61, %c0_62] : memref<2x8x32xf32, #tpu.memory_space<vmem>>, vector<2x8x32xf32>
    tpu.vector_store %arg15[%c0_60, %c0_61, %c0_62], %124 {strides = array<i32>} : memref<2x8x32xf32, #tpu.memory_space<vmem>>, vector<2x8x32xf32>,
    return
  }
  func.func @transform_0(%arg0: i32, %arg1: i32) -> (i32, i32, i32) {
    %c0_i32 = arith.constant 0 : i32
    %c0_i32_0 = arith.constant 0 : i32
    %c0_i32_1 = arith.constant 0 : i32
    return %arg0, %c0_i32, %c0_i32_0 : i32, i32, i32
  }
  func.func @transform_1(%arg0: i32, %arg1: i32) -> (i32, i32, i32) {
    %c0_i32 = arith.constant 0 : i32
    %c0_i32_0 = arith.constant 0 : i32
    %c0_i32_1 = arith.constant 0 : i32
    return %arg1, %c0_i32, %c0_i32_0 : i32, i32, i32
  }
  func.func @transform_2(%arg0: i32, %arg1: i32) -> (i32, i32, i32) {
    %c0_i32 = arith.constant 0 : i32
    %c0_i32_0 = arith.constant 0 : i32
    %c0_i32_1 = arith.constant 0 : i32
    return %arg1, %c0_i32, %c0_i32_0 : i32, i32, i32
  }
  func.func @transform_3(%arg0: i32, %arg1: i32) -> (i32, i32, i32) {
    %c0_i32 = arith.constant 0 : i32
    %c0_i32_0 = arith.constant 0 : i32
    %c0_i32_1 = arith.constant 0 : i32
    return %arg1, %c0_i32, %c0_i32_0 : i32, i32, i32
  }
  func.func @transform_4(%arg0: i32, %arg1: i32) -> (i32, i32, i32) {
    %c0_i32 = arith.constant 0 : i32
    %c0_i32_0 = arith.constant 0 : i32
    %c0_i32_1 = arith.constant 0 : i32
    return %arg1, %c0_i32, %c0_i32_0 : i32, i32, i32
  }
  func.func @transform_5(%arg0: i32, %arg1: i32) -> (i32, i32, i32) {
    %c0_i32 = arith.constant 0 : i32
    %c0_i32_0 = arith.constant 0 : i32
    %c0_i32_1 = arith.constant 0 : i32
    return %arg1, %c0_i32, %c0_i32_0 : i32, i32, i32
  }
  func.func @transform_6(%arg0: i32, %arg1: i32) -> (i32, i32, i32) {
    %c0_i32 = arith.constant 0 : i32
    %c0_i32_0 = arith.constant 0 : i32
    %c0_i32_1 = arith.constant 0 : i32
    return %arg1, %c0_i32, %c0_i32_0 : i32, i32, i32
  }
  func.func @transform_7(%arg0: i32, %arg1: i32) -> (i32, i32, i32) {
    %c0_i32 = arith.constant 0 : i32
    %c0_i32_0 = arith.constant 0 : i32
    %c0_i32_1 = arith.constant 0 : i32
    return %arg1, %c0_i32, %c0_i32_0 : i32, i32, i32
  }
  func.func @transform_8(%arg0: i32, %arg1: i32) -> (i32, i32, i32) {
    %c0_i32 = arith.constant 0 : i32
    %c0_i32_0 = arith.constant 0 : i32
    %c0_i32_1 = arith.constant 0 : i32
    return %arg1, %c0_i32, %c0_i32_0 : i32, i32, i32
  }
  func.func @transform_9(%arg0: i32, %arg1: i32) -> (i32, i32, i32) {
    %c0_i32 = arith.constant 0 : i32
    %c0_i32_0 = arith.constant 0 : i32
    %c0_i32_1 = arith.constant 0 : i32
    return %arg1, %c0_i32, %c0_i32_0 : i32, i32, i32
  }
  func.func @transform_10(%arg0: i32, %arg1: i32) -> (i32, i32, i32) {
    %c0_i32 = arith.constant 0 : i32
    %c0_i32_0 = arith.constant 0 : i32
    %c0_i32_1 = arith.constant 0 : i32
    return %arg1, %c0_i32, %c0_i32_0 : i32, i32, i32
  }
  func.func @transform_11(%arg0: i32, %arg1: i32) -> (i32, i32, i32) {
    %c0_i32 = arith.constant 0 : i32
    %c0_i32_0 = arith.constant 0 : i32
    %c0_i32_1 = arith.constant 0 : i32
    return %arg1, %c0_i32, %c0_i32_0 : i32, i32, i32
  }
  func.func @transform_12(%arg0: i32, %arg1: i32) -> (i32, i32, i32) {
    %c0_i32 = arith.constant 0 : i32
    %c0_i32_0 = arith.constant 0 : i32
    %c0_i32_1 = arith.constant 0 : i32
    return %arg1, %c0_i32, %c0_i32_0 : i32, i32, i32
  }
  func.func @transform_13(%arg0: i32, %arg1: i32) -> (i32, i32, i32) {
    %c0_i32 = arith.constant 0 : i32
    %c0_i32_0 = arith.constant 0 : i32
    %c0_i32_1 = arith.constant 0 : i32
    return %arg0, %c0_i32, %c0_i32_0 : i32, i32, i32
  }
}

</mosaic_0001>

<bundles_post_ra>
// kernel: encoder_forward.1
= control target key start
LH: loop header
LB: loop body
LE: loop exit
PB: predicated region body
PF: predicated region fallthrough
CT: control target
= control target key end

     0   :  { %s3743_s25 = smov 0   ;;  %s3745_s26 = smov 0   ;;  %s4306_s0 = inlined_call_operand.vmem [shape: f32[2,8,32], index: 0, kind: input, shape index: {}]   ;;  %s4307_s1 = inlined_call_operand.vmem [shape: bf16[2,32,96], index: 1, kind: input, shape index: {}]   ;;  %s4308_s2 = inlined_call_operand.vmem [shape: f32[2,1,96], index: 2, kind: input, shape index: {}]   ;;  %s4309_s3 = inlined_call_operand.vmem [shape: bf16[2,32,32], index: 3, kind: input, shape index: {}]   ;;  %s4310_s4 = inlined_call_operand.vmem [shape: f32[2,1,32], index: 4, kind: input, shape index: {}]   ;;  %s4311_s5 = inlined_call_operand.vmem [shape: bf16[2,32,64], index: 5, kind: input, shape index: {}]   ;;  %s4312_s6 = inlined_call_operand.vmem [shape: f32[2,1,64], index: 6, kind: input, shape index: {}]   ;;  %s4313_s7 = inlined_call_operand.vmem [shape: bf16[2,64,32], index: 7, kind: input, shape index: {}]   ;;  %s4314_s8 = inlined_call_operand.vmem [shape: f32[2,1,32], index: 8, kind: input, shape index: {}]   ;;  %s4315_s9 = inlined_call_operand.vmem [shape: f32[2,1,32], index: 9, kind: input, shape index: {}]   ;;  %s4316_s10 = inlined_call_operand.vmem [shape: f32[2,1,32], index: 10, kind: input, shape index: {}]   ;;  %s4317_s11 = inlined_call_operand.vmem [shape: f32[2,1,32], index: 11, kind: input, shape index: {}]   ;;  %s4318_s12 = inlined_call_operand.vmem [shape: f32[2,1,32], index: 12, kind: input, shape index: {}]   ;;  %s4319_s13 = inlined_call_operand.vmem [shape: f32[2,8,32], index: 13, kind: output, shape index: {}]  }
   0x1   :  { %4323 = sst [smem:[#allocation6_spill]] %s4307_s1  ;;  %s3747_s27 = smov 0  }
   0x2   :  { %4324 = sst [smem:[#allocation7_spill]] %s4309_s3 }
   0x3   :  { %4325 = sst [smem:[#allocation8_spill]] %s4311_s5 }
   0x4   :  { %4326 = sst [smem:[#allocation9_spill]] %s4312_s6 }
   0x5   :  { %4327 = sst [smem:[#allocation10_spill]] %s4319_s13 }
   0x6 LB: > { %4328 = sst [smem:[#allocation3_spill]] %s3655_s26  ;;  %s32_s28 = sadd.s32 1, %s3655_s26  ;;  %s3659_s27 = sphi %s3747_s27, %s23_s27   ;;  %s3655_s26 = sphi %s3745_s26, %s4342_s26   ;;  %s3651_s25 = sphi %s3743_s25, %s4341_s25  }
   0x7   : > { %4329 = sst [smem:[#allocation4_spill]] %s3659_s27  ;;  %p3284_p0 = scmp.ge.s32.totalorder %s3659_s27, 1 }
   0x8   : > { %p33_p1 = scmp.ge.s32.totalorder %s32_s28, 2  ;;  %p504_p2 = scmp.lt.s32.totalorder %s3659_s27, 3 }
   0xa   : > { %s4344_s28 = smov (%p33_p1, %s32_s28), 0  ;;  %p505_p3 = pnand %p3284_p0, %p504_p2 }
   0xb   : > { %4330 = sst [smem:[#allocation5_spill]] %s4344_s28  ;;  %p598_p4 = scmp.lt.s32.totalorder (!%p505_p3), %s3651_s25, 1 }
   0xc   : > { %508 = sbr.rel (%p505_p3) target bundleno = 2638 (0xa4e), region = 72  ;;  %s4331_s1 = sld [smem:[#allocation6_spill]] (!%p505_p3) }
   0xd   : > { %s4332_s3 = sld [smem:[#allocation7_spill]] (!%p505_p3)  ;;  %p3293_p5 = scmp.ne.s32.totalorder (!%p505_p3), %s3651_s25, 0 }
   0xe   : > { %s4333_s5 = sld [smem:[#allocation8_spill]] (!%p505_p3) }
  0x11   : > { %s3761_s29 = scalar_select %p598_p4, %s3651_s25, 1 }
  0x13   : > { %s3352_s30 = sshll.u32 %s3761_s29, 4  ;;  %s3355_s17 = sshll.u32 %s3761_s29, 5 }
  0x14   : > { %s602_s19 = scalar_lea.vmem %s4331_s1, %s3352_s30  ;;  %s3774_s22 = scalar_lea.vmem %s4332_s3, %s3352_s30 }
  0x15   : > { %s3783_s13 = scalar_lea.vmem %s4333_s5, %s3352_s30  ;;  %s3793_s20 = scalar_lea.vmem %s4313_s7, %s3355_s17 }
  0x16   : > { %s629_s23 = scalar_lea.vmem %s4314_s8, %s3761_s29  ;;  %s632_s26 = scalar_lea.vmem %s4315_s9, %s3761_s29 }
  0x17   : > { %s635_s5 = scalar_lea.vmem %s4316_s10, %s3761_s29  ;;  %s638_s16 = scalar_lea.vmem %s4317_s11, %s3761_s29 }
  0x18   : > { %s641_s17 = scalar_lea.vmem %s4318_s12, %s3761_s29  ;;  %652 = sbr.rel (%p3293_p5) target bundleno = 31 (0x1f), region = 76 }
  0x1d   : > { %v653_v0 = vld [vmem:[%s4306_s0] sm:$0xff]  ;;  %vm655_vm0 = vcmask 261120   ;;  %v654_v1 = vld [vmem:[%s4306_s0 + $0x8] sm:$0xff] }
  0x1e   : > { %656 = vst.msk [vmem:[#allocation2] sm:$0xff] %vm655_vm0, %v653_v0  ;;  %657 = vst.msk [vmem:[#allocation2 + $0x8] sm:$0xff] %vm655_vm0, %v654_v1 }
  0x1f PF: > { %v3585_v2 = vld [vmem:[%s602_s19 + $0x8] sm:$0xff]   ;;  %v3661_v3 = vmov 0.0   ;;  %v3586_v4 = vld [vmem:[%s602_s19] sm:$0xff]   ;;  %vm3662_vm1 = vmmov 0   ;;  %vm684_vm2 = vcmask 261120   ;;  %s4335_s19 = scalar_lea.vmem %s4308_s2, %s3761_s29  ;;  %s3663_s24 = smov 104   ;;  %v754_v23 = vlaneseq }
  0x20   : > { %3402 = vmatprep.subr.bf16.mxu0 %v3661_v3  ;;  %3410 = vmatprep.subr.bf16.mxu1 %v3661_v3  ;;  %v3294_v8 = vld [vmem:[%s4335_s19] ss:$0 sm:$0xff]  ;;  %s3664_s27 = smov 120   ;;  %s3665_s30 = smov 112   ;;  %v3668_v21 = vmov 1983009808  }
  0x21   : > { %3403 = vmatpush3.bf16.msra.mxu0 %v3585_v2  ;;  %3406 = vmatprep.mubr.msk.bf16.mxu0 %vm3662_vm1, %v3661_v3  ;;  %s3666_s14 = smov 96   ;;  %s3667_s15 = smov 64   ;;  %v752_v22 = vunpack.c.l.s4 %v3668_v21  ;;  %v755_v25 = vshrl.u32 %v754_v23, 7  ;;  %v3669_v26 = vmov 1934713408   ;;  %vm1637_vm3 = vcmask 64512  }
  0x22   : > { %3404 = vmatprep.subr.bf16.mxu0 %v3661_v3  ;;  %3412 = vmatprep.mubr.msk.bf16.mxu1 %vm3662_vm1, %v3661_v3  ;;  %v784_v27 = vunpack.c.l.s4 %v3669_v26  ;;  %vm2105_vm4 = vcmask 1043456   ;;  %s3670_s1 = smov 16   ;;  %s3672_s3 = smov 24   ;;  %vm2769_vm5 = vcmask 130048   ;;  %vm2772_vm6 = vcmask 195584  }
  0x23   : > { %v753_v24 = vunpack.c.0.s8 %v752_v22  ;;  %s4336_s21 = scalar_lea.vmem %s4310_s4, %s3761_s29  ;;  %vm3000_vm7 = vcmask 523264   ;;  %s4339_s18 = sld [smem:[#allocation10_spill]] }
  0x24   : > { %v785_v33 = vunpack.c.0.s8 %v784_v27 }
  0x25   : > { %v658_v5 = vld [vmem:[#allocation2] sm:$0xff]  ;;  %v659_v6 = vld [vmem:[#allocation2 + $0x8] sm:$0xff]  ;;  %3405 = vmatpush3.bf16.msra.mxu0 %v3586_v4  ;;  %v3863_v29 = vsub.s32 %v753_v24, %v755_v25 }
  0x26   : > { %v660_v7 = vpack.c.bf16 %v659_v6, %v658_v5  ;;  %3416 = vmatprep.subr.bf16.mxu0 %v3661_v3  ;;  %v3874_v38 = vsub.s32 %v785_v33, %v755_v25 }
  0x28   : > { %3407 = vmatmul.mubr.msk.bf16.vlgmr.msra.gmra.mxu0 %vm684_vm2, %v660_v7 }
  0x29   : > { %3418 = vmatprep.mubr.msk.bf16.mxu0 %vm3662_vm1, %v3661_v3 }
  0xe8   : > { %v722_v9 = vpop.f32.mrf.mxu0 }
  0xe9   : > { %v723_v10 = vadd.f32 %v3294_v8, %v722_v9 }
  0xea   : > { %v3408_v11 = vpop.f32.mrf.mxu0 }
  0xeb   : > { %743 = vrot.lane.b32.xlu1 %v723_v10, %s3663_s24  ;;  %731 = vrot.lane.b32.xlu0 %v723_v10, %s3664_s27 }
  0xec   : > { %v725_v12 = vpop.f32.mrf.mxu0 }
  0xed   : > { %v3837_v13 = vadd.f32 %v3294_v8, %v725_v12 }
  0xee   : > { %v3409_v14 = vpop.f32.mrf.mxu0 }
  0xef   : > { %737 = vrot.lane.b32.xlu0 %v723_v10, %s3665_s30  ;;  %733 = vrot.lane.b32.xlu1 %v3837_v13, %s3664_s27 }
  0xf3   : > { %739 = vrot.lane.b32.xlu0 %v3837_v13, %s3665_s30  ;;  %745 = vrot.lane.b32.xlu1 %v3837_v13, %s3663_s24 }
  0xf7   : > { %1029 = vrot.lane.b32.xlu0 %v723_v10, %s3666_s14 }
 0x15d   : > { %v3842_v15 = vpop.permute.xlu0 %731  ;;  %v3844_v16 = vpop.permute.xlu1 %743 }
 0x15e   : > { %1033 = vrot.lane.b32.xlu1 %v3842_v15, %s3666_s14  ;;  %v765_v30 = vcombine.low %v3842_v15, %v3844_v16  ;;  %v766_v32 = vcombine.high %v3842_v15, %v3844_v16 }
 0x160   : > { %v773_v35 = vrot.slane %v765_v30, %v3863_v29  ;;  %v780_v37 = vrot.slane %v766_v32, %v3863_v29 }
 0x161   : > { %v3847_v17 = vpop.permute.xlu0 %737  ;;  %v3851_v18 = vpop.permute.xlu1 %733 }
 0x162   : > { %1037 = vrot.lane.b32.xlu0 %v3847_v17, %s3666_s14  ;;  %1041 = vrot.lane.b32.xlu1 %v3844_v16, %s3666_s14  ;;  %v749_v28 = vcombine.low %v723_v10, %v3847_v17  ;;  %v750_v31 = vcombine.high %v723_v10, %v3847_v17 }
 0x164   : > { %v757_v34 = vrot.slane %v749_v28, %v3863_v29  ;;  %v764_v36 = vrot.slane %v750_v31, %v3863_v29 }
 0x165   : > { %v3855_v19 = vpop.permute.xlu0 %739  ;;  %v3857_v20 = vpop.permute.xlu1 %745 }
 0x166   : > { %1031 = vrot.lane.b32.xlu0 %v3837_v13, %s3666_s14  ;;  %1035 = vrot.lane.b32.xlu1 %v3851_v18, %s3666_s14  ;;  %v781_v39 = vcombine.low %v757_v34, %v773_v35  ;;  %v782_v40 = vcombine.high %v757_v34, %v773_v35  ;;  %v797_v41 = vcombine.low %v764_v36, %v780_v37 }
 0x167   : > { %v798_v42 = vcombine.high %v764_v36, %v780_v37  ;;  %v817_v43 = vcombine.low %v3837_v13, %v3855_v19  ;;  %v833_v44 = vcombine.low %v3851_v18, %v3857_v20  ;;  %v818_v47 = vcombine.high %v3837_v13, %v3855_v19 }
 0x168   : > { %v789_v45 = vrot.slane %v781_v39, %v3874_v38  ;;  %v796_v46 = vrot.slane %v782_v40, %v3874_v38  ;;  %v834_v48 = vcombine.high %v3851_v18, %v3857_v20  ;;  %v805_v49 = vrot.slane %v797_v41, %v3874_v38 }
 0x169   : > { %v812_v50 = vrot.slane %v798_v42, %v3874_v38  ;;  %v825_v51 = vrot.slane %v817_v43, %v3863_v29  ;;  %v841_v52 = vrot.slane %v833_v44, %v3863_v29  ;;  %v1030_v53 = vpop.permute.xlu0 %1029  ;;  %v832_v57 = vrot.slane %v818_v47, %v3863_v29 }
 0x16a   : > { %1039 = vrot.lane.b32.xlu0 %v3855_v19, %s3666_s14  ;;  %1043 = vrot.lane.b32.xlu1 %v3857_v20, %s3666_s14  ;;  %v885_v55 = vcombine.low %v789_v45, %v796_v46  ;;  %v3298_v56 = vcombine.high %v789_v45, %v796_v46  ;;  %v848_v58 = vrot.slane %v834_v48, %v3863_v29 }
 0x16b   : > { %v901_v59 = vcombine.low %v805_v49, %v812_v50  ;;  %v3299_v60 = vcombine.high %v805_v49, %v812_v50  ;;  %v849_v61 = vcombine.low %v825_v51, %v841_v52  ;;  %v850_v62 = vcombine.high %v825_v51, %v841_v52 }
 0x16c   : > { %v865_v6 = vcombine.low %v832_v57, %v848_v58  ;;  %v866_v7 = vcombine.high %v832_v57, %v848_v58  ;;  %v3893_v8 = vrot.slane %v885_v55, %v3863_v29  ;;  %v3896_v9 = vrot.slane %v3298_v56, %v3863_v29 }
 0x16d   : > { %v3903_v21 = vrot.slane %v849_v61, %v3874_v38  ;;  %v3906_v22 = vrot.slane %v850_v62, %v3874_v38  ;;  %v3909_v24 = vrot.slane %v901_v59, %v3863_v29  ;;  %v3912_v25 = vrot.slane %v3299_v60, %v3863_v29 }
 0x16e   : > { %1333 = vrot.lane.b32.xlu1 %v723_v10, %s3667_s15  ;;  %v3915_v32 = vrot.slane %v865_v6, %v3874_v38  ;;  %v3918_v33 = vrot.slane %v866_v7, %v3874_v38  ;;  %v917_v41 = vcombine.low %v3893_v8, %v3896_v9  ;;  %v918_v42 = vcombine.high %v3893_v8, %v3896_v9 }
 0x16f   : > { %v953_v39 = vcombine.low %v3903_v21, %v3906_v22  ;;  %v933_v43 = vcombine.low %v3909_v24, %v3912_v25 }
 0x1d0   : > { %v1034_v54 = vpop.permute.xlu1 %1033 }
 0x1d4   : > { %v1038_v63 = vpop.permute.xlu0 %1037  ;;  %v1042_v0 = vpop.permute.xlu1 %1041 }
 0x1d5   : > { %v1053_v1 = vcombine.low %v1030_v53, %v1038_v63  ;;  %v1054_v2 = vcombine.high %v1030_v53, %v1038_v63  ;;  %v1069_v4 = vcombine.low %v1034_v54, %v1042_v0  ;;  %v1070_v5 = vcombine.high %v1034_v54, %v1042_v0 }
 0x1d7   : > { %v1061_v10 = vrot.slane %v1053_v1, %v3863_v29  ;;  %v1068_v11 = vrot.slane %v1054_v2, %v3863_v29  ;;  %v1077_v12 = vrot.slane %v1069_v4, %v3863_v29  ;;  %v1084_v14 = vrot.slane %v1070_v5, %v3863_v29 }
 0x1d8   : > { %v1032_v23 = vpop.permute.xlu0 %1031  ;;  %v1036_v31 = vpop.permute.xlu1 %1035 }
 0x1d9   : > { %v1085_v26 = vcombine.low %v1061_v10, %v1077_v12  ;;  %v1086_v27 = vcombine.high %v1061_v10, %v1077_v12  ;;  %v1101_v28 = vcombine.low %v1068_v11, %v1084_v14  ;;  %v1102_v30 = vcombine.high %v1068_v11, %v1084_v14 }
 0x1db   : > { %v1093_v34 = vrot.slane %v1085_v26, %v3874_v38  ;;  %v1100_v35 = vrot.slane %v1086_v27, %v3874_v38  ;;  %v1109_v36 = vrot.slane %v1101_v28, %v3874_v38  ;;  %v1116_v37 = vrot.slane %v1102_v30, %v3874_v38 }
 0x1dc   : > { %v1040_v40 = vpop.permute.xlu0 %1039  ;;  %v1044_v48 = vpop.permute.xlu1 %1043  ;;  %v3300_v27 = vcombine.high %v3903_v21, %v3906_v22 }
 0x1dd   : > { %v1189_v44 = vcombine.low %v1093_v34, %v1100_v35  ;;  %v3302_v45 = vcombine.high %v1093_v34, %v1100_v35  ;;  %v1205_v46 = vcombine.low %v1109_v36, %v1116_v37  ;;  %v3303_v47 = vcombine.high %v1109_v36, %v1116_v37 }
 0x1de   : > { %v1121_v49 = vcombine.low %v1032_v23, %v1040_v40  ;;  %v1122_v50 = vcombine.high %v1032_v23, %v1040_v40  ;;  %v1137_v51 = vcombine.low %v1036_v31, %v1044_v48  ;;  %v1138_v52 = vcombine.high %v1036_v31, %v1044_v48 }
 0x1df   : > { %v1196_v53 = vrot.slane %v1189_v44, %v3863_v29  ;;  %v1204_v54 = vrot.slane %v3302_v45, %v3863_v29  ;;  %v1212_v55 = vrot.slane %v1205_v46, %v3863_v29  ;;  %v1220_v56 = vrot.slane %v3303_v47, %v3863_v29 }
 0x1e0   : > { %v1129_v57 = vrot.slane %v1121_v49, %v3863_v29  ;;  %v1136_v58 = vrot.slane %v1122_v50, %v3863_v29  ;;  %v1145_v59 = vrot.slane %v1137_v51, %v3863_v29  ;;  %v1152_v60 = vrot.slane %v1138_v52, %v3863_v29 }
 0x1e1   : > { %v1221_v61 = vcombine.low %v1196_v53, %v1204_v54  ;;  %v1237_v62 = vcombine.low %v1212_v55, %v1220_v56  ;;  %v1222_v63 = vcombine.high %v1196_v53, %v1204_v54  ;;  %v1238_v0 = vcombine.high %v1212_v55, %v1220_v56 }
 0x1e2   : > { %v1153_v1 = vcombine.low %v1129_v57, %v1145_v59  ;;  %v1154_v2 = vcombine.high %v1129_v57, %v1145_v59  ;;  %v1169_v4 = vcombine.low %v1136_v58, %v1152_v60  ;;  %v1170_v5 = vcombine.high %v1136_v58, %v1152_v60 }
 0x1e3   : > { %v1229_v6 = vrot.slane %v1221_v61, %v3874_v38  ;;  %v1245_v7 = vrot.slane %v1237_v62, %v3874_v38  ;;  %v1236_v10 = vrot.slane %v1222_v63, %v3874_v38  ;;  %v1252_v11 = vrot.slane %v1238_v0, %v3874_v38 }
 0x1e4   : > { %v1161_v12 = vrot.slane %v1153_v1, %v3874_v38  ;;  %v1168_v14 = vrot.slane %v1154_v2, %v3874_v38  ;;  %v1177_v23 = vrot.slane %v1169_v4, %v3874_v38  ;;  %v1184_v26 = vrot.slane %v1170_v5, %v3874_v38 }
 0x1e5   : > { %v1253_v28 = vcombine.low %v1229_v6, %v1245_v7  ;;  %v1254_v30 = vcombine.high %v1229_v6, %v1245_v7  ;;  %v925_v31 = vrot.slane %v917_v41, %v3874_v38  ;;  %v941_v45 = vrot.slane %v933_v43, %v3874_v38 }
 0x1e6   : > { %v1257_v34 = vcombine.low %v1161_v12, %v1168_v14  ;;  %v3304_v35 = vcombine.high %v1161_v12, %v1168_v14  ;;  %v1273_v36 = vcombine.low %v1177_v23, %v1184_v26  ;;  %v3305_v37 = vcombine.high %v1177_v23, %v1184_v26 }
 0x1e7   : > { %v1325_v40 = vpack.c.bf16 %v1253_v28, %v1253_v28  ;;  %v1326_v44 = vpack.c.bf16 %v1254_v30, %v1254_v30  ;;  %v1255_v46 = vcombine.low %v1236_v10, %v1252_v11  ;;  %v969_v41 = vcombine.low %v3915_v32, %v3918_v33 }
 0x1e8   : > { %v1264_v47 = vrot.slane %v1257_v34, %v3863_v29  ;;  %v1272_v48 = vrot.slane %v3304_v35, %v3863_v29  ;;  %v1280_v49 = vrot.slane %v1273_v36, %v3863_v29  ;;  %v1288_v50 = vrot.slane %v3305_v37, %v3863_v29 }
 0x1e9   : > { %v1642_v51 = vsel %vm1637_vm3, %v1325_v40, 0  ;;  %v1688_v52 = vsel %vm1637_vm3, %v1326_v44, 0  ;;  %v1256_v53 = vcombine.high %v1236_v10, %v1252_v11  ;;  %v3301_v43 = vcombine.high %v3915_v32, %v3918_v33 }
 0x1ea   : > { %3411 = vmatpush3.bf16.xpose.msra.mxu1 %v1642_v51  ;;  %3417 = vmatpush3.bf16.xpose.msra.mxu0 %v1688_v52  ;;  %v1289_v54 = vcombine.low %v1264_v47, %v1272_v48  ;;  %v1305_v55 = vcombine.low %v1280_v49, %v1288_v50  ;;  %v934_v56 = vcombine.high %v3909_v24, %v3912_v25 }
 0x1eb   : > { %v949_v57 = vcombine.low %v925_v31, %v941_v45  ;;  %v950_v58 = vcombine.high %v925_v31, %v941_v45  ;;  %3422 = vmatprep.subr.bf16.mxu1 %v3661_v3  ;;  %3428 = vmatprep.subr.bf16.mxu0 %v3661_v3  ;;  %v1327_v59 = vpack.c.bf16 %v1255_v46, %v1255_v46 }
 0x1ec   : > { %v1328_v60 = vpack.c.bf16 %v1256_v53, %v1256_v53  ;;  %v1297_v61 = vrot.slane %v1289_v54, %v3874_v38  ;;  %v1313_v62 = vrot.slane %v1305_v55, %v3874_v38  ;;  %v960_v32 = vrot.slane %v953_v39, %v3863_v29 }
 0x1ed   : > { %v968_v33 = vrot.slane %v3300_v27, %v3863_v29  ;;  %v976_v24 = vrot.slane %v969_v41, %v3863_v29  ;;  %v932_v25 = vrot.slane %v918_v42, %v3874_v38  ;;  %v984_v63 = vrot.slane %v3301_v43, %v3863_v29 }
 0x1ee   : > { %v1021_v0 = vpack.c.bf16 %v949_v57, %v949_v57  ;;  %v1022_v1 = vpack.c.bf16 %v950_v58, %v950_v58  ;;  %v948_v2 = vrot.slane %v934_v56, %v3874_v38  ;;  %v1734_v4 = vsel %vm1637_vm3, %v1327_v59, 0 }
 0x1ef   : > { %v1290_v5 = vcombine.high %v1264_v47, %v1272_v48  ;;  %v1780_v21 = vsel %vm1637_vm3, %v1328_v60, 0  ;;  %v1321_v22 = vcombine.low %v1297_v61, %v1313_v62  ;;  %v1322_v39 = vcombine.high %v1297_v61, %v1313_v62 }
 0x1f0   : > { %v1306_v6 = vcombine.high %v1280_v49, %v1288_v50  ;;  %v985_v8 = vcombine.low %v960_v32, %v968_v33  ;;  %v951_v9 = vcombine.low %v932_v25, %v948_v2  ;;  %v952_v42 = vcombine.high %v932_v25, %v948_v2 }
 0x1f1   : > { %3413 = vmatmul.mubr.msk.bf16.vlgmr.msra.gmra.mxu1 %vm1637_vm3, %v1021_v0  ;;  %3419 = vmatmul.mubr.msk.bf16.vlgmr.msra.gmra.mxu0 %vm1637_vm3, %v1022_v1  ;;  %v1001_v7 = vcombine.low %v976_v24, %v984_v63  ;;  %v1329_v10 = vpack.c.bf16 %v1321_v22, %v1321_v22  ;;  %v1330_v11 = vpack.c.bf16 %v1322_v39, %v1322_v39 }
 0x1f2   : > { %3423 = vmatpush3.bf16.xpose.msra.mxu1 %v1734_v4  ;;  %3429 = vmatpush3.bf16.xpose.msra.mxu0 %v1780_v21  ;;  %v1304_v12 = vrot.slane %v1290_v5, %v3874_v38  ;;  %v1320_v14 = vrot.slane %v1306_v6, %v3874_v38  ;;  %v1023_v23 = vpack.c.bf16 %v951_v9, %v951_v9 }
 0x1f3   : > { %3424 = vmatprep.mubr.msk.bf16.mxu1 %vm3662_vm1, %v3661_v3  ;;  %3430 = vmatprep.mubr.msk.bf16.mxu0 %vm3662_vm1, %v3661_v3  ;;  %v1024_v26 = vpack.c.bf16 %v952_v42, %v952_v42  ;;  %v993_v27 = vrot.slane %v985_v8, %v3874_v38  ;;  %v1009_v28 = vrot.slane %v1001_v7, %v3874_v38  ;;  %v1826_v30 = vsel %vm1637_vm3, %v1329_v10, 0 }
 0x1f4   : > { %3434 = vmatprep.subr.bf16.mxu1 %v3661_v3  ;;  %3440 = vmatprep.subr.bf16.mxu0 %v3661_v3  ;;  %v1872_v31 = vsel %vm1637_vm3, %v1330_v11, 0  ;;  %v1323_v34 = vcombine.low %v1304_v12, %v1320_v14  ;;  %v1324_v35 = vcombine.high %v1304_v12, %v1320_v14  ;;  %v986_v36 = vcombine.high %v960_v32, %v968_v33 }
 0x1f5   : > { %v1017_v37 = vcombine.low %v993_v27, %v1009_v28  ;;  %v1018_v40 = vcombine.high %v993_v27, %v1009_v28  ;;  %v1002_v44 = vcombine.high %v976_v24, %v984_v63 }
 0x1f6   : > { %v1331_v45 = vpack.c.bf16 %v1323_v34, %v1323_v34  ;;  %v1332_v46 = vpack.c.bf16 %v1324_v35, %v1324_v35  ;;  %v1000_v49 = vrot.slane %v986_v36, %v3874_v38 }
 0x1f7   : > { %v1025_v47 = vpack.c.bf16 %v1017_v37, %v1017_v37  ;;  %v1026_v48 = vpack.c.bf16 %v1018_v40, %v1018_v40  ;;  %v1016_v50 = vrot.slane %v1002_v44, %v3874_v38  ;;  %v1334_v40 = vpop.permute.xlu1 %1333 }
 0x1f8   : > { %v1918_v41 = vsel %vm1637_vm3, %v1331_v45, 0  ;;  %v1964_v51 = vsel %vm1637_vm3, %v1332_v46, 0 }
 0x1f9   : > { %3425 = vmatmul.mubr.msk.bf16.vlgmr.msra.gmra.mxu1 %vm1637_vm3, %v1023_v23  ;;  %3431 = vmatmul.mubr.msk.bf16.vlgmr.msra.gmra.mxu0 %vm1637_vm3, %v1024_v26  ;;  %v1019_v52 = vcombine.low %v1000_v49, %v1016_v50  ;;  %v1020_v53 = vcombine.high %v1000_v49, %v1016_v50 }
 0x1fa   : > { %3435 = vmatpush3.bf16.xpose.msra.mxu1 %v1826_v30  ;;  %3441 = vmatpush3.bf16.xpose.msra.mxu0 %v1872_v31 }
 0x1fb   : > { %3436 = vmatprep.mubr.msk.bf16.mxu1 %vm3662_vm1, %v3661_v3  ;;  %3442 = vmatprep.mubr.msk.bf16.mxu0 %vm3662_vm1, %v3661_v3  ;;  %v1027_v43 = vpack.c.bf16 %v1019_v52, %v1019_v52  ;;  %v1028_v54 = vpack.c.bf16 %v1020_v53, %v1020_v53 }
 0x1fc   : > { %3446 = vmatprep.subr.bf16.mxu1 %v3661_v3  ;;  %3452 = vmatprep.subr.bf16.mxu0 %v3661_v3 }
 0x201   : > { %3437 = vmatmul.mubr.msk.bf16.vlgmr.msra.gmra.mxu1 %vm1637_vm3, %v1025_v47  ;;  %3443 = vmatmul.mubr.msk.bf16.vlgmr.msra.gmra.mxu0 %vm1637_vm3, %v1026_v48 }
 0x202   : > { %3447 = vmatpush3.bf16.xpose.msra.mxu1 %v1918_v41  ;;  %3453 = vmatpush3.bf16.xpose.msra.mxu0 %v1964_v51 }
 0x203   : > { %3448 = vmatprep.mubr.msk.bf16.mxu1 %vm3662_vm1, %v3661_v3  ;;  %3454 = vmatprep.mubr.msk.bf16.mxu0 %vm3662_vm1, %v3661_v3 }
 0x204   : > { %3458 = vmatprep.subr.bf16.mxu1 %v3661_v3  ;;  %3464 = vmatprep.subr.bf16.mxu0 %v3661_v3 }
 0x209   : > { %3449 = vmatmul.mubr.msk.bf16.vlgmr.msra.gmra.mxu1 %vm1637_vm3, %v1027_v43  ;;  %3455 = vmatmul.mubr.msk.bf16.vlgmr.msra.gmra.mxu0 %vm1637_vm3, %v1028_v54 }
 0x20a   : > { %3460 = vmatprep.mubr.msk.bf16.mxu1 %vm3662_vm1, %v3661_v3  ;;  %3466 = vmatprep.mubr.msk.bf16.mxu0 %vm3662_vm1, %v3661_v3 }
 0x2b1   : > { %v1678_v55 = vpop.f32.mrf.mxu1  ;;  %v1724_v56 = vpop.f32.mrf.mxu0 }
 0x2b2   : > { %v2006_v57 = vsel %vm1637_vm3, %v1678_v55, -inf  ;;  %v2009_v58 = vsel %vm1637_vm3, %v1724_v56, -inf }
 0x2b3   : > { %2007 = vmax.xlane.f32.xlu0 %v2006_v57  ;;  %v3414_v59 = vpop.f32.mrf.mxu1  ;;  %2010 = vmax.xlane.f32.xlu1 %v2009_v58  ;;  %v3420_v60 = vpop.f32.mrf.mxu0 }
 0x2b5   : > { %v1681_v61 = vpop.f32.mrf.mxu1  ;;  %v1727_v62 = vpop.f32.mrf.mxu0 }
 0x2b7   : > { %v3415_v32 = vpop.f32.mrf.mxu1  ;;  %v3421_v33 = vpop.f32.mrf.mxu0 }
 0x2b9   : > { %v1770_v24 = vpop.f32.mrf.mxu1  ;;  %v1816_v25 = vpop.f32.mrf.mxu0 }
 0x2ba   : > { %v2012_v63 = vsel %vm1637_vm3, %v1770_v24, -inf  ;;  %v2015_v5 = vsel %vm1637_vm3, %v1816_v25, -inf }
 0x2bb   : > { %2013 = vmax.xlane.f32.xlu0 %v2012_v63  ;;  %v3426_v0 = vpop.f32.mrf.mxu1  ;;  %v3432_v1 = vpop.f32.mrf.mxu0 }
 0x2bd   : > { %v1773_v2 = vpop.f32.mrf.mxu1  ;;  %v1819_v4 = vpop.f32.mrf.mxu0 }
 0x2bf   : > { %v3427_v21 = vpop.f32.mrf.mxu1  ;;  %2016 = vmax.xlane.f32.xlu0 %v2015_v5  ;;  %v3433_v22 = vpop.f32.mrf.mxu0 }
 0x2c1   : > { %v1862_v39 = vpop.f32.mrf.mxu1  ;;  %v1908_v6 = vpop.f32.mrf.mxu0 }
 0x2c2   : > { %v2018_v8 = vsel %vm1637_vm3, %v1862_v39, -inf  ;;  %v2021_v9 = vsel %vm1637_vm3, %v1908_v6, -inf }
 0x2c3   : > { %v3438_v42 = vpop.f32.mrf.mxu1  ;;  %2019 = vmax.xlane.f32.xlu1 %v2018_v8  ;;  %2022 = vmax.xlane.f32.xlu0 %v2021_v9  ;;  %v3444_v7 = vpop.f32.mrf.mxu0 }
 0x2c5   : > { %v1865_v10 = vpop.f32.mrf.mxu1  ;;  %v1911_v11 = vpop.f32.mrf.mxu0 }
 0x2c7   : > { %v3439_v12 = vpop.f32.mrf.mxu1  ;;  %v3445_v14 = vpop.f32.mrf.mxu0 }
 0x2c9   : > { %v4028_v23 = vpop.f32.mrf.mxu1  ;;  %v4030_v26 = vpop.f32.mrf.mxu0 }
 0x2ca   : > { %v2024_v27 = vsel %vm1637_vm3, %v4028_v23, -inf  ;;  %v2027_v28 = vsel %vm1637_vm3, %v4030_v26, -inf }
 0x2cb   : > { %v3450_v30 = vpop.f32.mrf.mxu1  ;;  %2025 = vmax.xlane.f32.xlu1 %v2024_v27  ;;  %2028 = vmax.xlane.f32.xlu0 %v2027_v28  ;;  %v3456_v31 = vpop.f32.mrf.mxu0 }
 0x2cd   : > { %v1957_v34 = vpop.f32.mrf.mxu1  ;;  %v2003_v35 = vpop.f32.mrf.mxu0 }
 0x2cf   : > { %v3451_v36 = vpop.f32.mrf.mxu1  ;;  %v3457_v37 = vpop.f32.mrf.mxu0 }
 0x2dc   : > { %1341 = vrot.lane.b32.xlu1 %v3847_v17, %s3667_s15 }
 0x2e0   : > { %1345 = vrot.lane.b32.xlu1 %v3844_v16, %s3667_s15 }
 0x2e1   : > { %1337 = vrot.lane.b32.xlu0 %v3842_v15, %s3667_s15 }
 0x2e4   : > { %1335 = vrot.lane.b32.xlu1 %v3837_v13, %s3667_s15 }
 0x33c   : > { %v2008_v44 = vpop.xlane.xlu0 %2007  ;;  %v2011_v45 = vpop.xlane.xlu1 %2010 }
 0x33d   : > { %v2030_v46 = vsub.f32 %v1678_v55, %v2008_v44  ;;  %v2031_v47 = vsub.f32 %v1724_v56, %v2011_v45 }
 0x33f   : > { %v2038_v48 = vmul.f32 1.442695, %v2030_v46  ;;  %v2040_v49 = vmul.f32 1.442695, %v2031_v47 }
 0x341   : > { %3595 = vpow2.f32 %v2038_v48 }
 0x342   : > { %3597 = vpow2.f32 %v2040_v49 }
 0x344   : > { %v2014_v50 = vpop.xlane.xlu0 %2013 }
 0x345   : > { %v2032_v17 = vsub.f32 %v1770_v24, %v2014_v50 }
 0x347   : > { %v2042_v41 = vmul.f32 1.442695, %v2032_v17 }
 0x348   : > { %v2017_v51 = vpop.xlane.xlu0 %2016 }
 0x349   : > { %3599 = vpow2.f32 %v2042_v41  ;;  %v2033_v16 = vsub.f32 %v1816_v25, %v2017_v51 }
 0x34b   : > { %v2044_v52 = vmul.f32 1.442695, %v2033_v16 }
 0x34c   : > { %v2020_v15 = vpop.xlane.xlu1 %2019  ;;  %v2023_v53 = vpop.xlane.xlu0 %2022 }
 0x34d   : > { %3601 = vpow2.f32 %v2044_v52  ;;  %v2034_v13 = vsub.f32 %v1862_v39, %v2020_v15  ;;  %v2035_v43 = vsub.f32 %v1908_v6, %v2023_v53 }
 0x34e   : > { %v4044_v54 = vpop.eup %3595 }
 0x34f   : > { %v4046_v55 = vpop.eup %3597  ;;  %v2046_v56 = vmul.f32 1.442695, %v2034_v13  ;;  %v2048_v57 = vmul.f32 1.442695, %v2035_v43  ;;  %v2054_v58 = vsel %vm1637_vm3, %v4044_v54, 0.0 }
 0x350   : > { %2055 = vadd.xlane.f32.xlu1 %v2054_v58  ;;  %v2057_v59 = vsel %vm1637_vm3, %v4046_v55, 0.0 }
 0x351   : > { %3603 = vpow2.f32 %v2046_v56  ;;  %2058 = vadd.xlane.f32.xlu0 %v2057_v59 }
 0x352   : > { %3605 = vpow2.f32 %v2048_v57 }
 0x354   : > { %v4052_v60 = vpop.xlane.xlu1 %2025  ;;  %v4056_v62 = vpop.xlane.xlu0 %2028 }
 0x355   : > { %v2036_v59 = vsub.f32 %v4028_v23, %v4052_v60 }
 0x356   : > { %v4054_v61 = vpop.eup %3599 }
 0x357   : > { %v2060_v32 = vsel %vm1637_vm3, %v4054_v61, 0.0 }
 0x358   : > { %v1342_v33 = vpop.permute.xlu1 %1341  ;;  %2061 = vadd.xlane.f32.xlu0 %v2060_v32  ;;  %v1338_v1 = vpop.permute.xlu0 %1337  ;;  %v2050_v32 = vmul.f32 1.442695, %v2036_v59 }
 0x359   : > { %v1357_v25 = vcombine.low %v1334_v40, %v1342_v33  ;;  %v1358_v63 = vcombine.high %v1334_v40, %v1342_v33 }
 0x35a   : > { %v4060_v24 = vpop.eup %3601 }
 0x35b   : > { %v2063_v0 = vsel %vm1637_vm3, %v4060_v24, 0.0  ;;  %v1365_v22 = vrot.slane %v1357_v25, %v3863_v29  ;;  %v1372_v6 = vrot.slane %v1358_v63, %v3863_v29 }
 0x35c   : > { %v1346_v2 = vpop.permute.xlu1 %1345  ;;  %2064 = vadd.xlane.f32.xlu1 %v2063_v0 }
 0x35d   : > { %v1373_v4 = vcombine.low %v1338_v1, %v1346_v2  ;;  %v1374_v5 = vcombine.high %v1338_v1, %v1346_v2 }
 0x35e   : > { %v4064_v21 = vpop.eup %3603 }
 0x35f   : > { %v4067_v39 = vpop.eup %3605  ;;  %v1381_v8 = vrot.slane %v1373_v4, %v3863_v29  ;;  %v1388_v9 = vrot.slane %v1374_v5, %v3863_v29  ;;  %v2066_v42 = vsel %vm1637_vm3, %v4064_v21, 0.0 }
 0x360   : > { %2067 = vadd.xlane.f32.xlu0 %v2066_v42  ;;  %v2069_v14 = vsel %vm1637_vm3, %v4067_v39, 0.0 }
 0x361   : > { %v1389_v7 = vcombine.low %v1365_v22, %v1381_v8  ;;  %v1390_v10 = vcombine.high %v1365_v22, %v1381_v8  ;;  %v1405_v11 = vcombine.low %v1372_v6, %v1388_v9  ;;  %v1406_v12 = vcombine.high %v1372_v6, %v1388_v9 }
 0x363   : > { %v1397_v27 = vrot.slane %v1389_v7, %v3874_v38  ;;  %v1404_v28 = vrot.slane %v1390_v10, %v3874_v38  ;;  %v1413_v30 = vrot.slane %v1405_v11, %v3874_v38  ;;  %v1420_v31 = vrot.slane %v1406_v12, %v3874_v38 }
 0x364   : > { %2070 = vadd.xlane.f32.xlu0 %v2069_v14 }
 0x365   : > { %v1493_v34 = vcombine.low %v1397_v27, %v1404_v28  ;;  %v3306_v35 = vcombine.high %v1397_v27, %v1404_v28  ;;  %v1509_v36 = vcombine.low %v1413_v30, %v1420_v31  ;;  %v3307_v37 = vcombine.high %v1413_v30, %v1420_v31 }
 0x367   : > { %v1500_v40 = vrot.slane %v1493_v34, %v3863_v29  ;;  %v1508_v44 = vrot.slane %v3306_v35, %v3863_v29  ;;  %v1516_v45 = vrot.slane %v1509_v36, %v3863_v29  ;;  %v1524_v46 = vrot.slane %v3307_v37, %v3863_v29 }
 0x369   : > { %v1525_v47 = vcombine.low %v1500_v40, %v1508_v44  ;;  %v1541_v48 = vcombine.low %v1516_v45, %v1524_v46  ;;  %v1526_v49 = vcombine.high %v1500_v40, %v1508_v44  ;;  %v1542_v50 = vcombine.high %v1516_v45, %v1524_v46 }
 0x36b   : > { %v1533_v17 = vrot.slane %v1525_v47, %v3874_v38  ;;  %v1549_v41 = vrot.slane %v1541_v48, %v3874_v38  ;;  %v1540_v51 = vrot.slane %v1526_v49, %v3874_v38  ;;  %v1556_v16 = vrot.slane %v1542_v50, %v3874_v38 }
 0x36d   : > { %1343 = vrot.lane.b32.xlu1 %v3855_v19, %s3667_s15  ;;  %v1557_v52 = vcombine.low %v1533_v17, %v1549_v41  ;;  %v1558_v15 = vcombine.high %v1533_v17, %v1549_v41  ;;  %v1559_v53 = vcombine.low %v1540_v51, %v1556_v16  ;;  %v1560_v13 = vcombine.high %v1540_v51, %v1556_v16 }
 0x36e   : > { %v2037_v19 = vsub.f32 %v4030_v26, %v4056_v62  ;;  %v1336_v26 = vpop.permute.xlu1 %1335 }
 0x36f   : > { %v1629_v43 = vpack.c.bf16 %v1557_v52, %v1557_v52  ;;  %v1630_v56 = vpack.c.bf16 %v1558_v15, %v1558_v15  ;;  %v1631_v5 = vpack.c.bf16 %v1559_v53, %v1559_v53  ;;  %v1632_v8 = vpack.c.bf16 %v1560_v13, %v1560_v13 }
 0x371   : > { %1347 = vrot.lane.b32.xlu1 %v3857_v20, %s3667_s15  ;;  %v2107_v57 = vsel %vm2105_vm4, %v1629_v43, 0  ;;  %v2153_v58 = vsel %vm2105_vm4, %v1630_v56, 0  ;;  %v2052_v20 = vmul.f32 1.442695, %v2037_v19  ;;  %v2199_v10 = vsel %vm2105_vm4, %v1631_v5, 0 }
 0x372   : > { %3459 = vmatpush3.bf16.msra.mxu1 %v2107_v57  ;;  %3465 = vmatpush3.bf16.msra.mxu0 %v2153_v58  ;;  %v2245_v11 = vsel %vm2105_vm4, %v1632_v8, 0 }
 0x373   : > { %3470 = vmatprep.subr.bf16.mxu1 %v3661_v3  ;;  %3476 = vmatprep.subr.bf16.mxu0 %v3661_v3  ;;  %3607 = vpow2.f32 %v2052_v20 }
 0x374   : > { %3609 = vpow2.f32 %v2050_v32 }
 0x37a   : > { %1339 = vrot.lane.b32.xlu0 %v3851_v18, %s3667_s15 }
 0x380   : > { %v4102_v33 = vpop.eup %3607 }
 0x381   : > { %v2075_v25 = vsel %vm1637_vm3, %v4102_v33, 0.0  ;;  %v4106_v63 = vpop.eup %3609 }
 0x382   : > { %v2072_v18 = vsel %vm1637_vm3, %v4106_v63, 0.0 }
 0x395   : > { %2076 = vadd.xlane.f32.xlu1 %v2075_v25 }
 0x399   : > { %2073 = vadd.xlane.f32.xlu0 %v2072_v18 }
 0x3d9   : > { %v2056_v62 = vpop.xlane.xlu1 %2055 }
 0x3da   : > { %3611 = vrcp.f32 %v2056_v62  ;;  %v2059_v23 = vpop.xlane.xlu0 %2058 }
 0x3db   : > { %3613 = vrcp.f32 %v2059_v23 }
 0x3e1   : > { %v2062_v60 = vpop.xlane.xlu0 %2061 }
 0x3e2   : > { %3615 = vrcp.f32 %v2062_v60 }
 0x3e5   : > { %v2065_v0 = vpop.xlane.xlu1 %2064 }
 0x3e6   : > { %3617 = vrcp.f32 %v2065_v0 }
 0x3e7   : > { %v3612_v1 = vpop.eup %3611 }
 0x3e8   : > { %v3614_v2 = vpop.eup %3613  ;;  %v2086_v4 = vmul.f32 %v3612_v1, %v4044_v54 }
 0x3e9   : > { %v2068_v22 = vpop.xlane.xlu0 %2067  ;;  %v2087_v6 = vmul.f32 %v3614_v2, %v4046_v55  ;;  %v1344_v42 = vpop.permute.xlu1 %1343 }
 0x3ea   : > { %v2094_v9 = vpack.c.bf16 %v2086_v4, %v2086_v4  ;;  %v1425_v55 = vcombine.low %v1336_v26, %v1344_v42  ;;  %v1426_v14 = vcombine.high %v1336_v26, %v1344_v42  ;;  %3619 = vrcp.f32 %v2068_v22 }
 0x3eb   : > { %v2095_v7 = vpack.c.bf16 %v2087_v6, %v2087_v6 }
 0x3ec   : > { %3461 = vmatmul.mubr.msk.bf16.vlgmr.msra.gmra.mxu1 %vm1637_vm3, %v2094_v9  ;;  %v1433_v37 = vrot.slane %v1425_v55, %v3863_v29  ;;  %v1440_v40 = vrot.slane %v1426_v14, %v3863_v29 }
 0x3ed   : > { %3467 = vmatmul.mubr.msk.bf16.vlgmr.msra.gmra.mxu0 %vm1637_vm3, %v2095_v7  ;;  %3471 = vmatpush3.bf16.msra.mxu1 %v2199_v10  ;;  %v2071_v12 = vpop.xlane.xlu0 %2070  ;;  %v1348_v28 = vpop.permute.xlu1 %1347 }
 0x3ee   : > { %3477 = vmatpush3.bf16.msra.mxu0 %v2245_v11  ;;  %3472 = vmatprep.mubr.msk.bf16.mxu1 %vm3662_vm1, %v3661_v3  ;;  %3621 = vrcp.f32 %v2071_v12 }
 0x3ef   : > { %v3616_v54 = vpop.eup %3615  ;;  %3478 = vmatprep.mubr.msk.bf16.mxu0 %vm3662_vm1, %v3661_v3  ;;  %3482 = vmatprep.subr.bf16.mxu1 %v3661_v3 }
 0x3f0   : > { %v2088_v27 = vmul.f32 %v3616_v54, %v4054_v61  ;;  %3488 = vmatprep.subr.bf16.mxu0 %v3661_v3 }
 0x3f1   : > { %v1340_v30 = vpop.permute.xlu0 %1339 }
 0x3f2   : > { %v1441_v31 = vcombine.low %v1340_v30, %v1348_v28  ;;  %v1442_v34 = vcombine.high %v1340_v30, %v1348_v28  ;;  %v2096_v35 = vpack.c.bf16 %v2088_v27, %v2088_v27 }
 0x3f3   : > { %v3618_v36 = vpop.eup %3617 }
 0x3f4   : > { %v1449_v44 = vrot.slane %v1441_v31, %v3863_v29  ;;  %v1456_v45 = vrot.slane %v1442_v34, %v3863_v29  ;;  %3473 = vmatmul.mubr.msk.bf16.vlgmr.msra.gmra.mxu1 %vm1637_vm3, %v2096_v35  ;;  %v2089_v61 = vmul.f32 %v3618_v36, %v4060_v24 }
 0x3f5   : > { %3484 = vmatprep.mubr.msk.bf16.mxu1 %vm3662_vm1, %v3661_v3 }
 0x3f6   : > { %v1457_v46 = vcombine.low %v1433_v37, %v1449_v44  ;;  %v1458_v47 = vcombine.high %v1433_v37, %v1449_v44  ;;  %v1473_v48 = vcombine.low %v1440_v40, %v1456_v45  ;;  %v1474_v49 = vcombine.high %v1440_v40, %v1456_v45 }
 0x3f7   : > { %v2097_v50 = vpack.c.bf16 %v2089_v61, %v2089_v61  ;;  %v3620_v32 = vpop.eup %3619 }
 0x3f8   : > { %v1465_v17 = vrot.slane %v1457_v46, %v3874_v38  ;;  %v1472_v41 = vrot.slane %v1458_v47, %v3874_v38  ;;  %v1481_v51 = vrot.slane %v1473_v48, %v3874_v38  ;;  %v1488_v16 = vrot.slane %v1474_v49, %v3874_v38 }
 0x3f9   : > { %3479 = vmatmul.mubr.msk.bf16.vlgmr.msra.gmra.mxu0 %vm1637_vm3, %v2097_v50  ;;  %v2090_v22 = vmul.f32 %v3620_v32, %v4064_v21 }
 0x3fa   : > { %v1561_v52 = vcombine.low %v1465_v17, %v1472_v41  ;;  %v3308_v24 = vcombine.high %v1465_v17, %v1472_v41  ;;  %v1577_v15 = vcombine.low %v1481_v51, %v1488_v16  ;;  %v3309_v53 = vcombine.high %v1481_v51, %v1488_v16  ;;  %3490 = vmatprep.mubr.msk.bf16.mxu0 %vm3662_vm1, %v3661_v3 }
 0x3fb   : > { %v3622_v23 = vpop.eup %3621  ;;  %v2098_v10 = vpack.c.bf16 %v2090_v22, %v2090_v22 }
 0x3fc   : > { %v1568_v13 = vrot.slane %v1561_v52, %v3863_v29  ;;  %v1576_v43 = vrot.slane %v3308_v24, %v3863_v29  ;;  %v1584_v56 = vrot.slane %v1577_v15, %v3863_v29  ;;  %v1592_v57 = vrot.slane %v3309_v53, %v3863_v29 }
 0x3fd   : > { %v2091_v6 = vmul.f32 %v3622_v23, %v4067_v39 }
 0x3fe   : > { %v1593_v58 = vcombine.low %v1568_v13, %v1576_v43  ;;  %v1609_v19 = vcombine.low %v1584_v56, %v1592_v57  ;;  %v1594_v59 = vcombine.high %v1568_v13, %v1576_v43  ;;  %v1610_v20 = vcombine.high %v1584_v56, %v1592_v57 }
 0x3ff   : > { %v2099_v11 = vpack.c.bf16 %v2091_v6, %v2091_v6 }
 0x400   : > { %v1601_v25 = vrot.slane %v1593_v58, %v3874_v38  ;;  %v1617_v18 = vrot.slane %v1609_v19, %v3874_v38  ;;  %v1608_v26 = vrot.slane %v1594_v59, %v3874_v38  ;;  %v1624_v62 = vrot.slane %v1610_v20, %v3874_v38 }
 0x402   : > { %v1625_v60 = vcombine.low %v1601_v25, %v1617_v18  ;;  %v1626_v0 = vcombine.high %v1601_v25, %v1617_v18  ;;  %v1627_v1 = vcombine.low %v1608_v26, %v1624_v62  ;;  %v1628_v2 = vcombine.high %v1608_v26, %v1624_v62 }
 0x404   : > { %v1633_v4 = vpack.c.bf16 %v1625_v60, %v1625_v60  ;;  %v1634_v5 = vpack.c.bf16 %v1626_v0, %v1626_v0  ;;  %v1635_v42 = vpack.c.bf16 %v1627_v1, %v1627_v1  ;;  %v1636_v7 = vpack.c.bf16 %v1628_v2, %v1628_v2 }
 0x406   : > { %v2291_v8 = vsel %vm2105_vm4, %v1633_v4, 0  ;;  %v2337_v9 = vsel %vm2105_vm4, %v1634_v5, 0  ;;  %v2383_v21 = vsel %vm2105_vm4, %v1635_v42, 0  ;;  %v2429_v39 = vsel %vm2105_vm4, %v1636_v7, 0 }
 0x407   : > { %3483 = vmatpush3.bf16.msra.mxu1 %v2291_v8  ;;  %3489 = vmatpush3.bf16.msra.mxu0 %v2337_v9 }
 0x408   : > { %3494 = vmatprep.subr.bf16.mxu1 %v3661_v3  ;;  %3500 = vmatprep.subr.bf16.mxu0 %v3661_v3 }
 0x40a   : > { %3485 = vmatmul.mubr.msk.bf16.vlgmr.msra.gmra.mxu1 %vm1637_vm3, %v2098_v10  ;;  %3491 = vmatmul.mubr.msk.bf16.vlgmr.msra.gmra.mxu0 %vm1637_vm3, %v2099_v11 }
 0x40b   : > { %3495 = vmatpush3.bf16.msra.mxu1 %v2383_v21  ;;  %3501 = vmatpush3.bf16.msra.mxu0 %v2429_v39 }
 0x40c   : > { %3502 = vmatprep.mubr.msk.bf16.mxu0 %vm3662_vm1, %v3661_v3  ;;  %3496 = vmatprep.mubr.msk.bf16.mxu1 %vm3662_vm1, %v3661_v3 }
 0x40d   : > { %3506 = vmatprep.subr.bf16.mxu1 %v3661_v3  ;;  %3514 = vmatprep.subr.bf16.mxu0 %v3661_v3 }
 0x41e   : > { %v2077_v12 = vpop.xlane.xlu1 %2076 }
 0x41f   : > { %3623 = vrcp.f32 %v2077_v12 }
 0x422   : > { %v2074_v54 = vpop.xlane.xlu0 %2073 }
 0x423   : > { %3625 = vrcp.f32 %v2074_v54 }
 0x42c   : > { %v3624_v55 = vpop.eup %3623 }
 0x42d   : > { %v2093_v14 = vmul.f32 %v3624_v55, %v4102_v33 }
 0x42f   : > { %v2101_v27 = vpack.c.bf16 %v2093_v14, %v2093_v14 }
 0x430   : > { %v3626_v28 = vpop.eup %3625 }
 0x431   : > { %3503 = vmatmul.mubr.msk.bf16.vlgmr.msra.gmra.mxu0 %vm1637_vm3, %v2101_v27  ;;  %v2092_v30 = vmul.f32 %v3626_v28, %v4106_v63 }
 0x432   : > { %3518 = vmatprep.mubr.msk.bf16.mxu0 %vm3662_vm1, %v3661_v3 }
 0x433   : > { %v2100_v31 = vpack.c.bf16 %v2092_v30, %v2092_v30 }
 0x435   : > { %3497 = vmatmul.mubr.msk.bf16.vlgmr.msra.gmra.mxu1 %vm1637_vm3, %v2100_v31 }
 0x436   : > { %3510 = vmatprep.mubr.msk.bf16.mxu1 %vm3662_vm1, %v3661_v3 }
 0x4ac   : > { %v2143_v34 = vpop.f32.mrf.mxu1 }
 0x4ad   : > { %v2189_v35 = vpop.f32.mrf.mxu0 }
 0x4ae   : > { %v3462_v36 = vpop.f32.mrf.mxu1 }
 0x4af   : > { %v3468_v37 = vpop.f32.mrf.mxu0 }
 0x4b0   : > { %v2146_v33 = vpop.f32.mrf.mxu1 }
 0x4b1   : > { %v2192_v40 = vpop.f32.mrf.mxu0 }
 0x4b2   : > { %v3463_v44 = vpop.f32.mrf.mxu1 }
 0x4b3   : > { %v3469_v45 = vpop.f32.mrf.mxu0 }
 0x4b4   : > { %v2235_v61 = vpop.f32.mrf.mxu1 }
 0x4b5   : > { %v2471_v46 = vcombine.low %v2143_v34, %v2235_v61  ;;  %v2472_v63 = vcombine.high %v2143_v34, %v2235_v61 }
 0x4b6   : > { %v3474_v47 = vpop.f32.mrf.mxu1 }
 0x4b7   : > { %v2479_v16 = vrot.slane %v2471_v46, %v3863_v29  ;;  %v2486_v52 = vrot.slane %v2472_v63, %v3863_v29 }
 0x4b8   : > { %v2238_v48 = vpop.f32.mrf.mxu1 }
 0x4b9   : > { %v2281_v49 = vpop.f32.mrf.mxu0 }
 0x4ba   : > { %v2487_v50 = vcombine.low %v2189_v35, %v2281_v49  ;;  %v2488_v17 = vcombine.high %v2189_v35, %v2281_v49  ;;  %v3475_v41 = vpop.f32.mrf.mxu1 }
 0x4bb   : > { %v3480_v51 = vpop.f32.mrf.mxu0 }
 0x4bc   : > { %v2495_v24 = vrot.slane %v2487_v50, %v3863_v29  ;;  %v2502_v15 = vrot.slane %v2488_v17, %v3863_v29 }
 0x4bd   : > { %v2284_v53 = vpop.f32.mrf.mxu0 }
 0x4be   : > { %v2503_v13 = vcombine.low %v2479_v16, %v2495_v24  ;;  %v2504_v43 = vcombine.high %v2479_v16, %v2495_v24  ;;  %v2519_v56 = vcombine.low %v2486_v52, %v2502_v15  ;;  %v2520_v57 = vcombine.high %v2486_v52, %v2502_v15 }
 0x4bf   : > { %v3481_v58 = vpop.f32.mrf.mxu0 }
 0x4c0   : > { %v2511_v19 = vrot.slane %v2503_v13, %v3874_v38  ;;  %v2518_v59 = vrot.slane %v2504_v43, %v3874_v38  ;;  %v2527_v20 = vrot.slane %v2519_v56, %v3874_v38  ;;  %v2534_v32 = vrot.slane %v2520_v57, %v3874_v38  ;;  %v3587_v58 = vld [vmem:[%s3774_s22 + $0x8] sm:$0xff]  }
 0x4c1   : > { %3507 = vmatpush3.bf16.msra.mxu1 %v3587_v58 }
 0x4c2   : > { %v2607_v25 = vcombine.low %v2511_v19, %v2518_v59  ;;  %v3326_v18 = vcombine.high %v2511_v19, %v2518_v59  ;;  %v2623_v26 = vcombine.low %v2527_v20, %v2534_v32  ;;  %v3327_v62 = vcombine.high %v2527_v20, %v2534_v32  ;;  %3508 = vmatprep.subr.bf16.mxu1 %v3661_v3 }
 0x4c4   : > { %v2614_v23 = vrot.slane %v2607_v25, %v3863_v29  ;;  %v2622_v60 = vrot.slane %v3326_v18, %v3863_v29  ;;  %v2630_v0 = vrot.slane %v2623_v26, %v3863_v29  ;;  %v2638_v1 = vrot.slane %v3327_v62, %v3863_v29 }
 0x4c6   : > { %v2640_v2 = vcombine.high %v2614_v23, %v2622_v60  ;;  %v2656_v4 = vcombine.high %v2630_v0, %v2638_v1  ;;  %v2639_v5 = vcombine.low %v2614_v23, %v2622_v60  ;;  %v2655_v22 = vcombine.low %v2630_v0, %v2638_v1  ;;  %v3588_v23 = vld [vmem:[%s3774_s22] sm:$0xff]   ;;  %s3671_s22 = smov 8  }
 0x4c7   : > { %3509 = vmatpush3.bf16.msra.mxu1 %v3588_v23 }
 0x4c8   : > { %v4183_v6 = vrot.slane %v2640_v2, %v3874_v38  ;;  %v4186_v8 = vrot.slane %v2656_v4, %v3874_v38  ;;  %v4189_v9 = vrot.slane %v2639_v5, %v3874_v38  ;;  %v4192_v42 = vrot.slane %v2655_v22, %v3874_v38  ;;  %3522 = vmatprep.subr.bf16.mxu1 %v3661_v3 }
 0x4ca   : > { %v2327_v7 = vpop.f32.mrf.mxu1  ;;  %v2373_v10 = vpop.f32.mrf.mxu0  ;;  %v2673_v11 = vcombine.low %v4183_v6, %v4186_v8  ;;  %v2671_v21 = vcombine.low %v4189_v9, %v4192_v42  ;;  %v2672_v39 = vcombine.high %v4189_v9, %v4192_v42  ;;  %v2674_v12 = vcombine.high %v4183_v6, %v4186_v8  ;;  %v3330_v9 = vld [vmem:[%s4336_s21] ss:$0 sm:$0xff] }
 0x4cc   : > { %v3486_v54 = vpop.f32.mrf.mxu1  ;;  %v3492_v55 = vpop.f32.mrf.mxu0 }
 0x4ce   : > { %v2330_v14 = vpop.f32.mrf.mxu1  ;;  %v2376_v27 = vpop.f32.mrf.mxu0 }
 0x4d0   : > { %v3487_v28 = vpop.f32.mrf.mxu1  ;;  %v3493_v30 = vpop.f32.mrf.mxu0 }
 0x4f1   : > { %v2465_v31 = vpop.f32.mrf.mxu0 }
 0x4f2   : > { %v2555_v35 = vcombine.low %v2373_v10, %v2465_v31  ;;  %v2556_v36 = vcombine.high %v2373_v10, %v2465_v31 }
 0x4f3   : > { %v3504_v34 = vpop.f32.mrf.mxu0 }
 0x4f4   : > { %v2563_v46 = vrot.slane %v2555_v35, %v3863_v29  ;;  %v2570_v63 = vrot.slane %v2556_v36, %v3863_v29 }
 0x4f5   : > { %v2419_v37 = vpop.f32.mrf.mxu1  ;;  %v2468_v33 = vpop.f32.mrf.mxu0 }
 0x4f6   : > { %v2539_v40 = vcombine.low %v2327_v7, %v2419_v37  ;;  %v2540_v44 = vcombine.high %v2327_v7, %v2419_v37 }
 0x4f7   : > { %v3498_v45 = vpop.f32.mrf.mxu1  ;;  %v3505_v61 = vpop.f32.mrf.mxu0 }
 0x4f8   : > { %v2547_v47 = vrot.slane %v2539_v40, %v3863_v29  ;;  %v2554_v48 = vrot.slane %v2540_v44, %v3863_v29  ;;  %v3635_v40 = vld [vmem:[#allocation2] sm:$0xff] }
 0x4f9   : > { %v2422_v49 = vpop.f32.mrf.mxu1 }
 0x4fa   : > { %v2571_v50 = vcombine.low %v2547_v47, %v2563_v46  ;;  %v2572_v17 = vcombine.high %v2547_v47, %v2563_v46  ;;  %v2587_v41 = vcombine.low %v2554_v48, %v2570_v63  ;;  %v2588_v51 = vcombine.high %v2554_v48, %v2570_v63  ;;  %v3636_v47 = vld [vmem:[#allocation2 + $0x8] sm:$0xff] }
 0x4fb   : > { %v3499_v16 = vpop.f32.mrf.mxu1 }
 0x4fc   : > { %v2579_v52 = vrot.slane %v2571_v50, %v3874_v38  ;;  %v2586_v24 = vrot.slane %v2572_v17, %v3874_v38  ;;  %v2595_v15 = vrot.slane %v2587_v41, %v3874_v38  ;;  %v2602_v53 = vrot.slane %v2588_v51, %v3874_v38 }
 0x4fe   : > { %v2675_v13 = vcombine.low %v2579_v52, %v2586_v24  ;;  %v3328_v43 = vcombine.high %v2579_v52, %v2586_v24  ;;  %v2691_v56 = vcombine.low %v2595_v15, %v2602_v53  ;;  %v3329_v57 = vcombine.high %v2595_v15, %v2602_v53 }
 0x500   : > { %v2682_v19 = vrot.slane %v2675_v13, %v3863_v29  ;;  %v2690_v59 = vrot.slane %v3328_v43, %v3863_v29  ;;  %v2698_v20 = vrot.slane %v2691_v56, %v3863_v29  ;;  %v2706_v32 = vrot.slane %v3329_v57, %v3863_v29  ;;  %v3589_v43 = vld [vmem:[%s3783_s13 + $0x8] sm:$0xff]   ;;  %v3590_v56 = vld [vmem:[%s3783_s13] sm:$0xff]   ;;  %v3591_v57 = vld [vmem:[%s3793_s20 + $0x18] sm:$0xff]  }
 0x501   : > { %3515 = vmatpush3.bf16.msra.mxu0 %v3589_v43 }
 0x502   : > { %v2708_v25 = vcombine.high %v2682_v19, %v2690_v59  ;;  %v2724_v18 = vcombine.high %v2698_v20, %v2706_v32  ;;  %v2707_v26 = vcombine.low %v2682_v19, %v2690_v59  ;;  %v2723_v62 = vcombine.low %v2698_v20, %v2706_v32  ;;  %3516 = vmatprep.subr.bf16.mxu0 %v3661_v3 }
 0x504   : > { %v2722_v60 = vrot.slane %v2708_v25, %v3874_v38  ;;  %v2738_v0 = vrot.slane %v2724_v18, %v3874_v38  ;;  %v2715_v1 = vrot.slane %v2707_v26, %v3874_v38  ;;  %v2731_v2 = vrot.slane %v2723_v62, %v3874_v38  ;;  %v3334_v62 = vld [vmem:[%s632_s26] ss:$0 sm:$0xff] }
 0x505   : > { %3517 = vmatpush3.bf16.msra.mxu0 %v3590_v56 }
 0x506   : > { %v2741_v4 = vcombine.low %v2722_v60, %v2738_v0  ;;  %v2740_v5 = vcombine.high %v2715_v1, %v2731_v2  ;;  %v2739_v29 = vcombine.low %v2715_v1, %v2731_v2  ;;  %v2742_v10 = vcombine.high %v2722_v60, %v2738_v0  ;;  %v3335_v1 = vld [vmem:[%s635_s5] ss:$0 sm:$0xff]  ;;  %s4337_s5 = sld [smem:[#allocation9_spill]] }
 0x508   : > { %v3575_v22 = vpack.i.bf16 %v2741_v4, %v2673_v11  ;;  %v3570_v7 = vpack.i.bf16 %v2740_v5, %v2672_v39  ;;  %v3580_v54 = vpack.i.bf16 %v2742_v10, %v2674_v12  ;;  %v3594_v10 = vld [vmem:[%s3793_s20] sm:$0xff]  }
 0x50a   : > { %3576 = vrot.lane.b32.xlu1 %v3575_v22, %s3670_s1  ;;  %3571 = vrot.lane.b32.xlu0 %v3570_v7, %s3671_s22  ;;  %v3592_v22 = vld [vmem:[%s3793_s20 + $0x10] sm:$0xff]   ;;  %v3593_v7 = vld [vmem:[%s3793_s20 + $0x8] sm:$0xff]  }
 0x50c   : > { %s4338_s27 = scalar_lea.vmem %s4337_s5, %s3761_s29 }
 0x50e   : > { %3581 = vrot.lane.b32.xlu0 %v3580_v54, %s3672_s3  ;;  %v3336_v54 = vld [vmem:[%s4338_s27] ss:$0 sm:$0xff] }
 0x57c   : > { %v3577_v38 = vpop.permute.xlu1 %3576  ;;  %v3572_v55 = vpop.permute.xlu0 %3571 }
 0x57d   : > { %v3574_v14 = vunpack.i.h.bf16 %v3572_v55  ;;  %v3573_v27 = vunpack.i.l.bf16 %v3572_v55  ;;  %v3579_v28 = vunpack.i.h.bf16 %v3577_v38  ;;  %v3578_v30 = vunpack.i.l.bf16 %v3577_v38 }
 0x57f   : > { %v2767_v11 = vsel %vm1637_vm3, %v2671_v21, %v3573_v27  ;;  %v2768_v39 = vsel %vm1637_vm3, %v2739_v29, %v3574_v14 }
 0x580   : > { %v3582_v6 = vpop.permute.xlu0 %3581  ;;  %v2770_v31 = vsel %vm2769_vm5, %v2767_v11, %v3578_v30  ;;  %v2771_v34 = vsel %vm2769_vm5, %v2768_v39, %v3579_v28 }
 0x581   : > { %v3584_v8 = vunpack.i.h.bf16 %v3582_v6  ;;  %v3583_v12 = vunpack.i.l.bf16 %v3582_v6 }
 0x583   : > { %v2773_v35 = vsel %vm2772_vm6, %v2770_v31, %v3583_v12  ;;  %v2774_v36 = vsel %vm2772_vm6, %v2771_v34, %v3584_v8 }
 0x584   : > { %v2775_v37 = vpack.c.bf16 %v2774_v36, %v2773_v35 }
 0x586   : > { %3511 = vmatmul.mubr.msk.bf16.vlgmr.msra.gmra.mxu1 %vm684_vm2, %v2775_v37 }
 0x587   : > { %3530 = vmatprep.mubr.msk.bf16.mxu1 %vm3662_vm1, %v3661_v3  ;;  %3523 = vmatpush3.bf16.msra.mxu1 %v3591_v57 }
 0x588   : > { %3524 = vmatprep.subr.bf16.mxu1 %v3661_v3 }
 0x58b   : > { %3525 = vmatpush3.bf16.msra.mxu1 %v3592_v22 }
 0x58c   : > { %3526 = vmatprep.subr.bf16.mxu1 %v3661_v3 }
 0x58f   : > { %3527 = vmatpush3.bf16.msra.mxu1 %v3593_v7 }
 0x590   : > { %3528 = vmatprep.subr.bf16.mxu1 %v3661_v3  ;;  %v3340_v3 = vld [vmem:[%s629_s23] ss:$0 sm:$0xff] }
 0x593   : > { %3529 = vmatpush3.bf16.msra.mxu1 %v3594_v10 }
 0x646   : > { %v2836_v42 = vpop.f32.mrf.mxu1 }
 0x647   : > { %v2837_v21 = vadd.f32 %v3330_v9, %v2836_v42 }
 0x648   : > { %v3512_v33 = vpop.f32.mrf.mxu1 }
 0x649   : > { %v2843_v44 = vadd.f32 %v3635_v40, %v2837_v21 }
 0x64a   : > { %v2839_v45 = vpop.f32.mrf.mxu1 }
 0x64b   : > { %v2840_v61 = vadd.f32 %v3330_v9, %v2839_v45  ;;  %v2847_v46 = vsel %vm684_vm2, %v2843_v44, 0.0 }
 0x64c   : > { %2848 = vadd.xlane.f32.xlu1 %v2847_v46  ;;  %v3513_v63 = vpop.f32.mrf.mxu1 }
 0x64d   : > { %v2844_v48 = vadd.f32 %v3636_v47, %v2840_v61 }
 0x64f   : > { %v2850_v49 = vsel %vm684_vm2, %v2844_v48, 0.0 }
 0x650   : > { %2851 = vadd.xlane.f32.xlu0 %v2850_v49 }
 0x6d5   : > { %v2849_v50 = vpop.xlane.xlu1 %2848 }
 0x6d6   : > { %v2854_v17 = vmul.f32 0.03125, %v2849_v50 }
 0x6d8   : > { %v2856_v41 = vsub.f32 %v2843_v44, %v2854_v17 }
 0x6d9   : > { %v2852_v51 = vpop.xlane.xlu0 %2851 }
 0x6da   : > { %v2855_v16 = vmul.f32 0.03125, %v2852_v51  ;;  %v2858_v52 = vmul.f32 %v2856_v41, %v2856_v41 }
 0x6dc   : > { %v2857_v24 = vsub.f32 %v2844_v48, %v2855_v16  ;;  %v2860_v15 = vsel %vm684_vm2, %v2858_v52, 0.0 }
 0x6dd   : > { %2861 = vadd.xlane.f32.xlu0 %v2860_v15  ;;  %v3346_v15 = vld [vmem:[%s638_s16] ss:$0 sm:$0xff] }
 0x6de   : > { %v2859_v53 = vmul.f32 %v2857_v24, %v2857_v24 }
 0x6e0   : > { %v2863_v13 = vsel %vm684_vm2, %v2859_v53, 0.0 }
 0x6e1   : > { %2864 = vadd.xlane.f32.xlu1 %v2863_v13  ;;  %v3347_v13 = vld [vmem:[%s641_s17] ss:$0 sm:$0xff] }
 0x766   : > { %v2862_v58 = vpop.xlane.xlu0 %2861 }
 0x767   : > { %v2866_v19 = vmul.f32 0.03125, %v2862_v58 }
 0x769   : > { %v2868_v59 = vadd.f32 1e-05, %v2866_v19 }
 0x76a   : > { %v2865_v20 = vpop.xlane.xlu1 %2864 }
 0x76b   : > { %3627 = vrsqrt.f32 %v2868_v59  ;;  %v2867_v32 = vmul.f32 0.03125, %v2865_v20 }
 0x76d   : > { %v2869_v25 = vadd.f32 1e-05, %v2867_v32 }
 0x76f   : > { %3629 = vrsqrt.f32 %v2869_v25 }
 0x778   : > { %v3628_v18 = vpop.eup %3627 }
 0x779   : > { %v2872_v26 = vmul.f32 %v3628_v18, %v2856_v41 }
 0x77b   : > { %v2880_v0 = vmul.f32 %v3334_v62, %v2872_v26 }
 0x77c   : > { %v3630_v23 = vpop.eup %3629 }
 0x77d   : > { %v2873_v60 = vmul.f32 %v3630_v23, %v2857_v24  ;;  %v2888_v4 = vadd.f32 %v3335_v1, %v2880_v0 }
 0x77f   : > { %v2881_v2 = vmul.f32 %v3334_v62, %v2873_v60 }
 0x781   : > { %v2889_v5 = vadd.f32 %v3335_v1, %v2881_v2 }
 0x783   : > { %v2890_v29 = vpack.c.bf16 %v2889_v5, %v2888_v4 }
 0x785   : > { %3519 = vmatmul.mubr.msk.bf16.vlgmr.msra.gmra.mxu0 %vm684_vm2, %v2890_v29 }
 0x845   : > { %v2951_v38 = vpop.f32.mrf.mxu0 }
 0x846   : > { %v2952_v14 = vadd.f32 %v3336_v54, %v2951_v38 }
 0x847   : > { %v3520_v55 = vpop.f32.mrf.mxu0 }
 0x848   : > { %v2958_v11 = vmax.f32 %v2952_v14, 0.0 }
 0x849   : > { %v2954_v27 = vpop.f32.mrf.mxu0 }
 0x84a   : > { %v2955_v28 = vadd.f32 %v3336_v54, %v2954_v27 }
 0x84b   : > { %v3521_v30 = vpop.f32.mrf.mxu0 }
 0x84c   : > { %v2959_v39 = vmax.f32 %v2955_v28, 0.0 }
 0x84e   : > { %v2960_v6 = vpack.c.bf16 %v2959_v39, %v2958_v11 }
 0x850   : > { %3531 = vmatmul.mubr.msk.bf16.vlgmr.msra.gmra.mxu1 %vm3000_vm7, %v2960_v6 }
 0x910   : > { %v3038_v8 = vpop.f32.mrf.mxu1 }
 0x911   : > { %v3039_v12 = vadd.f32 %v3340_v3, %v3038_v8 }
 0x912   : > { %v3532_v31 = vpop.f32.mrf.mxu1 }
 0x913   : > { %v3045_v34 = vadd.f32 %v3039_v12, %v2888_v4 }
 0x914   : > { %v3041_v35 = vpop.f32.mrf.mxu1 }
 0x915   : > { %v3042_v36 = vadd.f32 %v3340_v3, %v3041_v35  ;;  %v3049_v37 = vsel %vm684_vm2, %v3045_v34, 0.0 }
 0x916   : > { %3050 = vadd.xlane.f32.xlu0 %v3049_v37  ;;  %v3533_v9 = vpop.f32.mrf.mxu1 }
 0x917   : > { %v3046_v42 = vadd.f32 %v3042_v36, %v2889_v5 }
 0x919   : > { %v3052_v21 = vsel %vm684_vm2, %v3046_v42, 0.0 }
 0x91a   : > { %3053 = vadd.xlane.f32.xlu1 %v3052_v21 }
 0x99f   : > { %v3051_v33 = vpop.xlane.xlu0 %3050 }
 0x9a0   : > { %v3055_v40 = vmul.f32 0.03125, %v3051_v33 }
 0x9a2   : > { %v3057_v44 = vsub.f32 %v3045_v34, %v3055_v40 }
 0x9a3   : > { %v3054_v45 = vpop.xlane.xlu1 %3053 }
 0x9a4   : > { %v3056_v61 = vmul.f32 0.03125, %v3054_v45  ;;  %v3059_v46 = vmul.f32 %v3057_v44, %v3057_v44 }
 0x9a6   : > { %v3058_v63 = vsub.f32 %v3046_v42, %v3056_v61  ;;  %v3061_v47 = vsel %vm684_vm2, %v3059_v46, 0.0 }
 0x9a7   : > { %3062 = vadd.xlane.f32.xlu0 %v3061_v47 }
 0x9a8   : > { %v3060_v48 = vmul.f32 %v3058_v63, %v3058_v63 }
 0x9aa   : > { %v3064_v49 = vsel %vm684_vm2, %v3060_v48, 0.0 }
 0x9ab   : > { %3065 = vadd.xlane.f32.xlu1 %v3064_v49 }
 0xa30   : > { %v3063_v50 = vpop.xlane.xlu0 %3062 }
 0xa31   : > { %v3067_v17 = vmul.f32 0.03125, %v3063_v50 }
 0xa33   : > { %v3069_v41 = vadd.f32 1e-05, %v3067_v17 }
 0xa34   : > { %v3066_v51 = vpop.xlane.xlu1 %3065 }
 0xa35   : > { %3631 = vrsqrt.f32 %v3069_v41  ;;  %v3068_v16 = vmul.f32 0.03125, %v3066_v51 }
 0xa37   : > { %v3070_v52 = vadd.f32 1e-05, %v3068_v16 }
 0xa39   : > { %3633 = vrsqrt.f32 %v3070_v52 }
 0xa42   : > { %v3632_v24 = vpop.eup %3631 }
 0xa43   : > { %v3073_v53 = vmul.f32 %v3632_v24, %v3057_v44 }
 0xa45   : > { %v3081_v43 = vmul.f32 %v3346_v15, %v3073_v53 }
 0xa46   : > { %v3634_v56 = vpop.eup %3633 }
 0xa47   : > { %v3089_v57 = vadd.f32 %v3347_v13, %v3081_v43  ;;  %v3074_v58 = vmul.f32 %v3634_v56, %v3058_v63 }
 0xa49   : > { %3091 = vst.msk [vmem:[#allocation2] sm:$0xff] %vm684_vm2, %v3089_v57  ;;  %3093 = vst.msk [vmem:[%s4339_s18] sm:$0xff] %vm684_vm2, %v3089_v57  ;;  %v3082_v19 = vmul.f32 %v3346_v15, %v3074_v58 }
 0xa4b   : > { %v3090_v59 = vadd.f32 %v3347_v13, %v3082_v19 }
 0xa4d   : > { %3092 = vst.msk [vmem:[#allocation2 + $0x8] sm:$0xff] %vm684_vm2, %v3090_v59  ;;  %3094 = vst.msk [vmem:[%s4339_s18 + $0x8] sm:$0xff] %vm684_vm2, %v3090_v59 }
 0xa4e PF: > { %s4340_s29 = sld [smem:[#allocation4_spill]] }
 0xa4f   : > { %s4341_s25 = sld [smem:[#allocation3_spill]] }
 0xa50   : > { %s4342_s26 = sld [smem:[#allocation5_spill]] }
 0xa54   : > { %s23_s27 = sadd.s32 1, %s4340_s29  }
 0xa55   : > { %p20_p6 = scmp.ge.s32.totalorder %s23_s27, 4  }
 0xa57   :  { %22 = sbr.rel (!%p20_p6) target bundleno = 6 (0x6), region = 142 }

</bundles_post_ra>
